<compile_context>
chip_gen: v5e
topology: v5e:2x2
jax: 0.10.0
libtpu: 0.0.40
codegen_flags: <defaults>
</compile_context>

<pallas_src>
import functools

import jax
import jax.numpy as jnp
from jax.experimental import pallas as pl
from jax.experimental.pallas import tpu as pltpu

# ----------------- model config (small, consistent with the module) -----------------
VOCAB = 40        # vocab_size
ATT_DIM = 32      # arch_kwargs['att_dim']
NHEAD = 4         # attention heads
FFN_DIM = 64      # feedforward dim
NUM_LAYERS = 2    # num_layers (kept small)
MAX_LEN = 64      # positional-encoding table length
V_PAD = 128       # lane-dense padded vocab width (kernel output last dim)
NEG_INF = -1e30


# ----------------------------- in-kernel helpers ------------------------------------
def _layer_norm(x, gamma, beta, eps=1e-5):
    # torch nn.LayerNorm semantics (biased variance over last dim), f32 math
    mu = jnp.mean(x, axis=-1, keepdims=True)
    var = jnp.mean((x - mu) ** 2, axis=-1, keepdims=True)
    return (x - mu) * jax.lax.rsqrt(var + eps) * gamma + beta


# ------------------------- fused transformer-LM kernel -------------------------------
def xfmr_lm_kernel(x_ref,
                   wqkv_ref, bqkv_ref, wo_ref, bo_ref,
                   w1_ref, b1_ref, w2_ref, b2_ref,
                   ln1g_ref, ln1b_ref, ln2g_ref, ln2b_ref,
                   wd_ref, bd_ref, o_ref, *, nhead, num_layers):
    _, T, E = x_ref.shape
    dh = E // nhead

    x = x_ref[0].astype(jnp.float32)           # residual stream in f32, (T, E)

    # causal bias for this batch element, built once in-kernel (no HBM input)
    row = jax.lax.broadcasted_iota(jnp.int32, (T, T), 0)
    col = jax.lax.broadcasted_iota(jnp.int32, (T, T), 1)
    bias = jnp.where(col <= row, 0.0, NEG_INF).astype(jnp.float32)   # (T, T)

    for l in range(num_layers):                # static unroll over layers
        xb = x.astype(jnp.bfloat16)

        # fused QKV projection (bf16 MXU operands, f32 accumulation).
        # 1/sqrt(dh) query scaling is already folded into the Q columns host-side.
        qkv = jnp.dot(xb, wqkv_ref[l],
                      preferred_element_type=jnp.float32) + bqkv_ref[l]   # (T, 3E)
        qkv_b = qkv.astype(jnp.bfloat16)

        # head-batched attention: (H, T, dh)
        qh = jnp.stack([qkv_b[:, h * dh:(h + 1) * dh]
                        for h in range(nhead)], axis=0)
        kh = jnp.stack([qkv_b[:, E + h * dh:E + (h + 1) * dh]
                        for h in range(nhead)], axis=0)
        vh = jnp.stack([qkv_b[:, 2 * E + h * dh:2 * E + (h + 1) * dh]
                        for h in range(nhead)], axis=0)

        s = jnp.einsum('htd,hsd->hts', qh, kh,
                       preferred_element_type=jnp.float32)        # (H, T, T)
        s = s + bias[None]
        s = s - jnp.max(s, axis=-1, keepdims=True)
        p = jnp.exp(s)
        p = p * pl.reciprocal(jnp.sum(p, axis=-1, keepdims=True), approx=True)

        ctx = jnp.einsum('hts,hsd->htd', p.astype(jnp.bfloat16), vh,
                         preferred_element_type=jnp.float32)      # (H, T, dh)
        ctx_cat = jnp.concatenate([ctx[h] for h in range(nhead)], axis=-1)  # (T, E)

        attn = jnp.dot(ctx_cat.astype(jnp.bfloat16), wo_ref[l],
                       preferred_element_type=jnp.float32) + bo_ref[l]

        # post-norm torch TransformerEncoderLayer (norm_first=False, relu, eval mode)
        h1 = _layer_norm(x + attn, ln1g_ref[l], ln1b_ref[l])

        ff = jnp.dot(h1.astype(jnp.bfloat16), w1_ref[l],
                     preferred_element_type=jnp.float32) + b1_ref[l]
        ff = jnp.maximum(ff, 0.0)
        ff = jnp.dot(ff.astype(jnp.bfloat16), w2_ref[l],
                     preferred_element_type=jnp.float32) + b2_ref[l]

        x = _layer_norm(h1 + ff, ln2g_ref[l], ln2b_ref[l])

    # vocab projection, lane-dense (V padded to 128)
    y = jnp.dot(x.astype(jnp.bfloat16), wd_ref[...],
                preferred_element_type=jnp.float32) + bd_ref[...]
    o_ref[0] = y.astype(o_ref.dtype)


def run_xfmr_lm(x_nte, params):
    """x_nte: (N, T, E) f32 -> (N, T, V_PAD) f32."""
    N, T, E = x_nte.shape
    kernel = functools.partial(xfmr_lm_kernel, nhead=NHEAD, num_layers=NUM_LAYERS)

    weights = [
        params["wqkv"], params["bqkv"], params["wo"], params["bo"],
        params["w1"], params["b1"], params["w2"], params["b2"],
        params["ln1_g"], params["ln1_b"], params["ln2_g"], params["ln2_b"],
        params["dist_w"], params["dist_b"],
    ]

    def const_spec(a):
        return pl.BlockSpec(a.shape, lambda n, _nd=a.ndim: (0,) * _nd)

    in_specs = ([pl.BlockSpec((1, T, E), lambda n: (n, 0, 0))]
                + [const_spec(a) for a in weights])

    return pl.pallas_call(
        kernel,
        out_shape=jax.ShapeDtypeStruct((N, T, V_PAD), jnp.float32),
        grid=(N,),
        in_specs=in_specs,
        out_specs=pl.BlockSpec((1, T, V_PAD), lambda n: (n, 0, 0)),
        compiler_params=pltpu.CompilerParams(dimension_semantics=("parallel",)),
    )(x_nte, *weights)


# --------------------------------- parameter init ------------------------------------
def make_pos_enc(max_len, dim):
    pos = jnp.arange(max_len, dtype=jnp.float32)[:, None]
    div = jnp.exp(jnp.arange(0, dim, 2, dtype=jnp.float32) * (-jnp.log(10000.0) / dim))
    pe = jnp.zeros((max_len, dim), dtype=jnp.float32)
    pe = pe.at[:, 0::2].set(jnp.sin(pos * div))
    pe = pe.at[:, 1::2].set(jnp.cos(pos * div))
    return pe


def init_layer_params(key, E, F, nhead):
    k = jax.random.split(key, 4)
    # torch-shaped weights (out_features, in_features)
    w_in = jax.random.normal(k[0], (3 * E, E), jnp.float32) * 0.05   # in_proj_weight
    b_in = jnp.zeros((3 * E,), jnp.float32)                          # in_proj_bias
    w_out = jax.random.normal(k[1], (E, E), jnp.float32) * 0.05      # out_proj.weight
    b_out = jnp.zeros((E,), jnp.float32)
    w1 = jax.random.normal(k[2], (F, E), jnp.float32) * 0.05         # linear1.weight
    b1 = jnp.zeros((F,), jnp.float32)
    w2 = jax.random.normal(k[3], (E, F), jnp.float32) * 0.05         # linear2.weight
    b2 = jnp.zeros((E,), jnp.float32)

    # fused QKV weight for x @ W (shape (E, 3E)); fold torch MHA's 1/sqrt(dh)
    # query scaling into the Q columns so the kernel skips the runtime multiply.
    dh = E // nhead
    scale = float(dh) ** -0.5
    wqkv = w_in.T
    wqkv = wqkv.at[:, :E].multiply(scale)
    bqkv = b_in.reshape(1, 3 * E)
    bqkv = bqkv.at[:, :E].multiply(scale)

    return dict(
        wqkv=wqkv, bqkv=bqkv,
        wo=w_out.T, bo=b_out.reshape(1, E),
        w1=w1.T, b1=b1.reshape(1, F),
        w2=w2.T, b2=b2.reshape(1, E),
        ln1_g=jnp.ones((1, E), jnp.float32), ln1_b=jnp.zeros((1, E), jnp.float32),
        ln2_g=jnp.ones((1, E), jnp.float32), ln2_b=jnp.zeros((1, E), jnp.float32),
    )


def init_params(key):
    keys = jax.random.split(key, 2 + NUM_LAYERS)
    layers = [init_layer_params(keys[2 + i], ATT_DIM, FFN_DIM, NHEAD)
              for i in range(NUM_LAYERS)]

    def stk(name):                 # stack per-layer params -> leading L dim
        return jnp.stack([lp[name] for lp in layers], axis=0)

    def mm(name):                  # MXU-operand weights in bf16
        return stk(name).astype(jnp.bfloat16)

    dist_w = jax.random.normal(keys[1], (VOCAB, ATT_DIM), jnp.float32) * 0.05
    dist_w_pad = jnp.zeros((ATT_DIM, V_PAD), jnp.float32).at[:, :VOCAB].set(dist_w.T)
    dist_b_pad = jnp.zeros((1, V_PAD), jnp.float32)

    return dict(
        vocab_embed=jax.random.normal(keys[0], (VOCAB, ATT_DIM), jnp.float32) * 0.05,
        pos_enc=make_pos_enc(MAX_LEN, ATT_DIM),
        wqkv=mm("wqkv"), bqkv=stk("bqkv"),
        wo=mm("wo"), bo=stk("bo"),
        w1=mm("w1"), b1=stk("b1"), w2=mm("w2"), b2=stk("b2"),
        ln1_g=stk("ln1_g"), ln1_b=stk("ln1_b"),
        ln2_g=stk("ln2_g"), ln2_b=stk("ln2_b"),
        dist_w=dist_w_pad.astype(jnp.bfloat16), dist_b=dist_b_pad,
    )


# ------------------------------------ forward ----------------------------------------
def torch_xfmr_lm_forward(params, token, hidden=None, token_len=None):
    """
    token:  (N, T) int32
    hidden: previous embeddings (T_prev, N, E) or None
    return: output (N, T_total, V), hidden (T_total, N, E)
    """
    assert token_len is None  # TODO(synk): padding_mask(token_len) not supported here
    t = 0 if hidden is None else hidden.shape[0]
    N, T = token.shape

    # glue: embedding lookup + abs sinusoidal positional encoding
    emb = jnp.take(params["vocab_embed"], token, axis=0)              # (N, T, E)
    token_embed = emb + params["pos_enc"][t:t + T][None, :, :]        # (N, T, E)
    tne = jnp.transpose(token_embed, (1, 0, 2))                       # (T, N, E)

    hidden_new = tne if hidden is None else jnp.concatenate([hidden, tne], axis=0)
    x_nte = jnp.transpose(hidden_new, (1, 0, 2))                      # (N, T_total, E)

    y = run_xfmr_lm(x_nte, params)                                    # (N, T_total, V_PAD)
    output = y[:, :, :VOCAB]                                          # (N, T_total, V)
    return output, hidden_new


# ------------------------------------- main -------------------------------------------
if __name__ == "__main__":
    key = jax.random.PRNGKey(0)
    pkey, tkey = jax.random.split(key)
    params = init_params(pkey)

    N, T = 2, 8
    token = jax.random.randint(tkey, (N, T), 0, VOCAB, dtype=jnp.int32)

    output, hidden = torch_xfmr_lm_forward(params, token)
    output, hidden = jax.block_until_ready((output, hidden))

    assert output.shape == (N, T, VOCAB), output.shape
    assert hidden.shape == (T, N, ATT_DIM), hidden.shape
    assert bool(jnp.all(jnp.isfinite(output)))
    print("KERNEL_OK")
</pallas_src>

<mosaic_0001>
module attributes {stable_mosaic.version = 11 : i64} {
  func.func @xfmr_lm_kernel(%arg0: i32, %arg1: memref<1x8x32xf32, #tpu.memory_space<vmem>>, %arg2: memref<2x32x96xbf16, #tpu.memory_space<vmem>>, %arg3: memref<2x1x96xf32, #tpu.memory_space<vmem>>, %arg4: memref<2x32x32xbf16, #tpu.memory_space<vmem>>, %arg5: memref<2x1x32xf32, #tpu.memory_space<vmem>>, %arg6: memref<2x32x64xbf16, #tpu.memory_space<vmem>>, %arg7: memref<2x1x64xf32, #tpu.memory_space<vmem>>, %arg8: memref<2x64x32xbf16, #tpu.memory_space<vmem>>, %arg9: memref<2x1x32xf32, #tpu.memory_space<vmem>>, %arg10: memref<2x1x32xf32, #tpu.memory_space<vmem>>, %arg11: memref<2x1x32xf32, #tpu.memory_space<vmem>>, %arg12: memref<2x1x32xf32, #tpu.memory_space<vmem>>, %arg13: memref<2x1x32xf32, #tpu.memory_space<vmem>>, %arg14: memref<32x128xbf16, #tpu.memory_space<vmem>>, %arg15: memref<1x128xf32, #tpu.memory_space<vmem>>, %arg16: memref<1x8x128xf32, #tpu.memory_space<vmem>>) attributes {dimension_semantics = [#tpu.dimension_semantics<parallel>], iteration_bounds = array<i64: 2>, scalar_prefetch = 0 : i64, scratch_operands = 0 : i64, tpu.core_type = #tpu.core_type<tc>, window_params = [{transform_indices = @transform_0, window_bounds = array<i64: 1, 8, 32>}, {pipeline_mode = #tpu.pipeline_mode<synchronous>, transform_indices = @transform_1, window_bounds = array<i64: 2, 32, 96>}, {pipeline_mode = #tpu.pipeline_mode<synchronous>, transform_indices = @transform_2, window_bounds = array<i64: 2, 1, 96>}, {pipeline_mode = #tpu.pipeline_mode<synchronous>, transform_indices = @transform_3, window_bounds = array<i64: 2, 32, 32>}, {pipeline_mode = #tpu.pipeline_mode<synchronous>, transform_indices = @transform_4, window_bounds = array<i64: 2, 1, 32>}, {pipeline_mode = #tpu.pipeline_mode<synchronous>, transform_indices = @transform_5, window_bounds = array<i64: 2, 32, 64>}, {pipeline_mode = #tpu.pipeline_mode<synchronous>, transform_indices = @transform_6, window_bounds = array<i64: 2, 1, 64>}, {pipeline_mode = #tpu.pipeline_mode<synchronous>, transform_indices = @transform_7, window_bounds = array<i64: 2, 64, 32>}, {pipeline_mode = #tpu.pipeline_mode<synchronous>, transform_indices = @transform_8, window_bounds = array<i64: 2, 1, 32>}, {pipeline_mode = #tpu.pipeline_mode<synchronous>, transform_indices = @transform_9, window_bounds = array<i64: 2, 1, 32>}, {pipeline_mode = #tpu.pipeline_mode<synchronous>, transform_indices = @transform_10, window_bounds = array<i64: 2, 1, 32>}, {pipeline_mode = #tpu.pipeline_mode<synchronous>, transform_indices = @transform_11, window_bounds = array<i64: 2, 1, 32>}, {pipeline_mode = #tpu.pipeline_mode<synchronous>, transform_indices = @transform_12, window_bounds = array<i64: 2, 1, 32>}, {pipeline_mode = #tpu.pipeline_mode<synchronous>, transform_indices = @transform_13, window_bounds = array<i64: 32, 128>}, {pipeline_mode = #tpu.pipeline_mode<synchronous>, transform_indices = @transform_14, window_bounds = array<i64: 1, 128>}, {transform_indices = @transform_15, window_bounds = array<i64: 1, 8, 128>}]} {
    %c0 = arith.constant 0 : index
    %c0_0 = arith.constant 0 : index
    %c0_1 = arith.constant 0 : index
    %0 = vector.load %arg1[%c0, %c0_0, %c0_1] : memref<1x8x32xf32, #tpu.memory_space<vmem>>, vector<1x8x32xf32>
    %1 = vector.shape_cast %0 : vector<1x8x32xf32> to vector<8x32xf32>
    %2 = tpu.iota {dimensions = array<i32: 0>} : vector<8x8xi32>
    %3 = tpu.iota {dimensions = array<i32: 1>} : vector<8x8xi32>
    %4 = arith.cmpi sle, %3, %2 : vector<8x8xi32>
    %cst = arith.constant 0.000000e+00 : f32
    %cst_2 = arith.constant -1.000000e+30 : f32
    %5 = vector.broadcast %cst : f32 to vector<8x8xf32>
    %6 = vector.broadcast %cst_2 : f32 to vector<8x8xf32>
    %7 = arith.select %4, %5, %6 : vector<8x8xi1>, vector<8x8xf32>
    %8 = arith.truncf %1 : vector<8x32xf32> to vector<8x32xbf16>
    %c0_3 = arith.constant 0 : index
    %c0_4 = arith.constant 0 : index
    %c0_5 = arith.constant 0 : index
    %9 = vector.load %arg2[%c0_3, %c0_4, %c0_5] : memref<2x32x96xbf16, #tpu.memory_space<vmem>>, vector<1x32x96xbf16>
    %10 = vector.shape_cast %9 : vector<1x32x96xbf16> to vector<32x96xbf16>
    %cst_6 = arith.constant dense<0.000000e+00> : vector<8x96xf32>
    %11 = tpu.matmul %8, %10, %cst_6 {dimension_numbers = #tpu.dot_dimension_numbers<[1], [0], [0], [1], [0, 0, 1, 1], [], []>} : vector<8x32xbf16>, vector<32x96xbf16>, vector<8x96xf32> -> vector<8x96xf32>
    %c0_7 = arith.constant 0 : index
    %c0_8 = arith.constant 0 : index
    %c0_9 = arith.constant 0 : index
    %12 = vector.load %arg3[%c0_7, %c0_8, %c0_9] : memref<2x1x96xf32, #tpu.memory_space<vmem>>, vector<1x1x96xf32>
    %13 = vector.shape_cast %12 : vector<1x1x96xf32> to vector<1x96xf32>
    %14 = vector.broadcast %13 : vector<1x96xf32> to vector<8x96xf32>
    %15 = arith.addf %11, %14 : vector<8x96xf32>
    %16 = arith.truncf %15 : vector<8x96xf32> to vector<8x96xbf16>
    %17 = vector.extract_strided_slice %16 {offsets = [0, 0], sizes = [8, 8], strides = [1, 1]} : vector<8x96xbf16> to vector<8x8xbf16>
    %18 = vector.extract_strided_slice %16 {offsets = [0, 8], sizes = [8, 8], strides = [1, 1]} : vector<8x96xbf16> to vector<8x8xbf16>
    %19 = vector.extract_strided_slice %16 {offsets = [0, 16], sizes = [8, 8], strides = [1, 1]} : vector<8x96xbf16> to vector<8x8xbf16>
    %20 = vector.extract_strided_slice %16 {offsets = [0, 24], sizes = [8, 8], strides = [1, 1]} : vector<8x96xbf16> to vector<8x8xbf16>
    %21 = vector.shape_cast %17 : vector<8x8xbf16> to vector<1x8x8xbf16>
    %22 = vector.shape_cast %18 : vector<8x8xbf16> to vector<1x8x8xbf16>
    %23 = vector.shape_cast %19 : vector<8x8xbf16> to vector<1x8x8xbf16>
    %24 = vector.shape_cast %20 : vector<8x8xbf16> to vector<1x8x8xbf16>
    %25 = tpu.concatenate %21, %22, %23, %24 in 0 : vector<1x8x8xbf16>, vector<1x8x8xbf16>, vector<1x8x8xbf16>, vector<1x8x8xbf16> -> vector<4x8x8xbf16>
    %26 = vector.extract_strided_slice %16 {offsets = [0, 32], sizes = [8, 8], strides = [1, 1]} : vector<8x96xbf16> to vector<8x8xbf16>
    %27 = vector.extract_strided_slice %16 {offsets = [0, 40], sizes = [8, 8], strides = [1, 1]} : vector<8x96xbf16> to vector<8x8xbf16>
    %28 = vector.extract_strided_slice %16 {offsets = [0, 48], sizes = [8, 8], strides = [1, 1]} : vector<8x96xbf16> to vector<8x8xbf16>
    %29 = vector.extract_strided_slice %16 {offsets = [0, 56], sizes = [8, 8], strides = [1, 1]} : vector<8x96xbf16> to vector<8x8xbf16>
    %30 = vector.shape_cast %26 : vector<8x8xbf16> to vector<1x8x8xbf16>
    %31 = vector.shape_cast %27 : vector<8x8xbf16> to vector<1x8x8xbf16>
    %32 = vector.shape_cast %28 : vector<8x8xbf16> to vector<1x8x8xbf16>
    %33 = vector.shape_cast %29 : vector<8x8xbf16> to vector<1x8x8xbf16>
    %34 = tpu.concatenate %30, %31, %32, %33 in 0 : vector<1x8x8xbf16>, vector<1x8x8xbf16>, vector<1x8x8xbf16>, vector<1x8x8xbf16> -> vector<4x8x8xbf16>
    %35 = vector.extract_strided_slice %16 {offsets = [0, 64], sizes = [8, 8], strides = [1, 1]} : vector<8x96xbf16> to vector<8x8xbf16>
    %36 = vector.extract_strided_slice %16 {offsets = [0, 72], sizes = [8, 8], strides = [1, 1]} : vector<8x96xbf16> to vector<8x8xbf16>
    %37 = vector.extract_strided_slice %16 {offsets = [0, 80], sizes = [8, 8], strides = [1, 1]} : vector<8x96xbf16> to vector<8x8xbf16>
    %38 = vector.extract_strided_slice %16 {offsets = [0, 88], sizes = [8, 8], strides = [1, 1]} : vector<8x96xbf16> to vector<8x8xbf16>
    %39 = vector.shape_cast %35 : vector<8x8xbf16> to vector<1x8x8xbf16>
    %40 = vector.shape_cast %36 : vector<8x8xbf16> to vector<1x8x8xbf16>
    %41 = vector.shape_cast %37 : vector<8x8xbf16> to vector<1x8x8xbf16>
    %42 = vector.shape_cast %38 : vector<8x8xbf16> to vector<1x8x8xbf16>
    %43 = tpu.concatenate %39, %40, %41, %42 in 0 : vector<1x8x8xbf16>, vector<1x8x8xbf16>, vector<1x8x8xbf16>, vector<1x8x8xbf16> -> vector<4x8x8xbf16>
    "tpu.trace_start"() <{level = 10 : i32, message = "htd,hsd->hts"}> : () -> ()
    %cst_10 = arith.constant dense<0.000000e+00> : vector<4x8x8xf32>
    %44 = tpu.matmul %25, %34, %cst_10 {dimension_numbers = #tpu.dot_dimension_numbers<[2], [2], [1], [1], [0, 0, 0, 1, 1, 1], [0], [0]>} : vector<4x8x8xbf16>, vector<4x8x8xbf16>, vector<4x8x8xf32> -> vector<4x8x8xf32>
    "tpu.trace_stop"() : () -> ()
    %45 = vector.shape_cast %7 : vector<8x8xf32> to vector<1x8x8xf32>
    %46 = vector.broadcast %45 : vector<1x8x8xf32> to vector<4x8x8xf32>
    %47 = arith.addf %44, %46 : vector<4x8x8xf32>
    %cst_11 = arith.constant dense<0xFF800000> : vector<4x8xf32>
    %48 = vector.multi_reduction <maximumf>, %47, %cst_11 [2] : vector<4x8x8xf32> to vector<4x8xf32>
    %49 = vector.shape_cast %48 : vector<4x8xf32> to vector<4x8x1xf32>
    %50 = vector.broadcast %49 : vector<4x8x1xf32> to vector<4x8x8xf32>
    %51 = arith.subf %47, %50 : vector<4x8x8xf32>
    %52 = math.exp %51 : vector<4x8x8xf32>
    %cst_12 = arith.constant dense<0.000000e+00> : vector<4x8xf32>
    %53 = vector.multi_reduction <add>, %52, %cst_12 [2] : vector<4x8x8xf32> to vector<4x8xf32>
    %54 = vector.shape_cast %53 : vector<4x8xf32> to vector<4x8x1xf32>
    %55 = tpu.reciprocal %54 {approx = true} : vector<4x8x1xf32> -> vector<4x8x1xf32>
    %56 = vector.broadcast %55 : vector<4x8x1xf32> to vector<4x8x8xf32>
    %57 = arith.mulf %52, %56 : vector<4x8x8xf32>
    %58 = arith.truncf %57 : vector<4x8x8xf32> to vector<4x8x8xbf16>
    "tpu.trace_start"() <{level = 10 : i32, message = "hts,hsd->htd"}> : () -> ()
    %cst_13 = arith.constant dense<0.000000e+00> : vector<4x8x8xf32>
    %59 = tpu.matmul %58, %43, %cst_13 {dimension_numbers = #tpu.dot_dimension_numbers<[2], [1], [1], [2], [0, 0, 0, 1, 1, 2], [0], [0]>} : vector<4x8x8xbf16>, vector<4x8x8xbf16>, vector<4x8x8xf32> -> vector<4x8x8xf32>
    "tpu.trace_stop"() : () -> ()
    %60 = vector.extract_strided_slice %59 {offsets = [0, 0, 0], sizes = [1, 8, 8], strides = [1, 1, 1]} : vector<4x8x8xf32> to vector<1x8x8xf32>
    %61 = vector.shape_cast %60 : vector<1x8x8xf32> to vector<8x8xf32>
    %62 = vector.extract_strided_slice %59 {offsets = [1, 0, 0], sizes = [1, 8, 8], strides = [1, 1, 1]} : vector<4x8x8xf32> to vector<1x8x8xf32>
    %63 = vector.shape_cast %62 : vector<1x8x8xf32> to vector<8x8xf32>
    %64 = vector.extract_strided_slice %59 {offsets = [2, 0, 0], sizes = [1, 8, 8], strides = [1, 1, 1]} : vector<4x8x8xf32> to vector<1x8x8xf32>
    %65 = vector.shape_cast %64 : vector<1x8x8xf32> to vector<8x8xf32>
    %66 = vector.extract_strided_slice %59 {offsets = [3, 0, 0], sizes = [1, 8, 8], strides = [1, 1, 1]} : vector<4x8x8xf32> to vector<1x8x8xf32>
    %67 = vector.shape_cast %66 : vector<1x8x8xf32> to vector<8x8xf32>
    %68 = tpu.concatenate %61, %63, %65, %67 in 1 : vector<8x8xf32>, vector<8x8xf32>, vector<8x8xf32>, vector<8x8xf32> -> vector<8x32xf32>
    %69 = arith.truncf %68 : vector<8x32xf32> to vector<8x32xbf16>
    %c0_14 = arith.constant 0 : index
    %c0_15 = arith.constant 0 : index
    %c0_16 = arith.constant 0 : index
    %70 = vector.load %arg4[%c0_14, %c0_15, %c0_16] : memref<2x32x32xbf16, #tpu.memory_space<vmem>>, vector<1x32x32xbf16>
    %71 = vector.shape_cast %70 : vector<1x32x32xbf16> to vector<32x32xbf16>
    %cst_17 = arith.constant dense<0.000000e+00> : vector<8x32xf32>
    %72 = tpu.matmul %69, %71, %cst_17 {dimension_numbers = #tpu.dot_dimension_numbers<[1], [0], [0], [1], [0, 0, 1, 1], [], []>} : vector<8x32xbf16>, vector<32x32xbf16>, vector<8x32xf32> -> vector<8x32xf32>
    %c0_18 = arith.constant 0 : index
    %c0_19 = arith.constant 0 : index
    %c0_20 = arith.constant 0 : index
    %73 = vector.load %arg5[%c0_18, %c0_19, %c0_20] : memref<2x1x32xf32, #tpu.memory_space<vmem>>, vector<1x1x32xf32>
    %74 = vector.shape_cast %73 : vector<1x1x32xf32> to vector<1x32xf32>
    %75 = vector.broadcast %74 : vector<1x32xf32> to vector<8x32xf32>
    %76 = arith.addf %72, %75 : vector<8x32xf32>
    %77 = arith.addf %1, %76 : vector<8x32xf32>
    %c0_21 = arith.constant 0 : index
    %c0_22 = arith.constant 0 : index
    %c0_23 = arith.constant 0 : index
    %78 = vector.load %arg10[%c0_21, %c0_22, %c0_23] : memref<2x1x32xf32, #tpu.memory_space<vmem>>, vector<1x1x32xf32>
    %79 = vector.shape_cast %78 : vector<1x1x32xf32> to vector<1x32xf32>
    %c0_24 = arith.constant 0 : index
    %c0_25 = arith.constant 0 : index
    %c0_26 = arith.constant 0 : index
    %80 = vector.load %arg11[%c0_24, %c0_25, %c0_26] : memref<2x1x32xf32, #tpu.memory_space<vmem>>, vector<1x1x32xf32>
    %81 = vector.shape_cast %80 : vector<1x1x32xf32> to vector<1x32xf32>
    %cst_27 = arith.constant dense<0.000000e+00> : vector<8xf32>
    %82 = vector.multi_reduction <add>, %77, %cst_27 [1] : vector<8x32xf32> to vector<8xf32>
    %83 = vector.shape_cast %82 : vector<8xf32> to vector<8x1xf32>
    %cst_28 = arith.constant 3.200000e+01 : f32
    %84 = vector.broadcast %cst_28 : f32 to vector<8x1xf32>
    %85 = arith.divf %83, %84 : vector<8x1xf32>
    %86 = vector.broadcast %85 : vector<8x1xf32> to vector<8x32xf32>
    %87 = arith.subf %77, %86 : vector<8x32xf32>
    %88 = arith.mulf %87, %87 : vector<8x32xf32>
    %cst_29 = arith.constant dense<0.000000e+00> : vector<8xf32>
    %89 = vector.multi_reduction <add>, %88, %cst_29 [1] : vector<8x32xf32> to vector<8xf32>
    %90 = vector.shape_cast %89 : vector<8xf32> to vector<8x1xf32>
    %cst_30 = arith.constant 3.200000e+01 : f32
    %91 = vector.broadcast %cst_30 : f32 to vector<8x1xf32>
    %92 = arith.divf %90, %91 : vector<8x1xf32>
    %93 = vector.broadcast %85 : vector<8x1xf32> to vector<8x32xf32>
    %94 = arith.subf %77, %93 : vector<8x32xf32>
    %cst_31 = arith.constant 9.99999974E-6 : f32
    %95 = vector.broadcast %cst_31 : f32 to vector<8x1xf32>
    %96 = arith.addf %92, %95 : vector<8x1xf32>
    %97 = math.rsqrt %96 : vector<8x1xf32>
    %98 = vector.broadcast %97 : vector<8x1xf32> to vector<8x32xf32>
    %99 = arith.mulf %94, %98 : vector<8x32xf32>
    %100 = vector.broadcast %79 : vector<1x32xf32> to vector<8x32xf32>
    %101 = arith.mulf %99, %100 : vector<8x32xf32>
    %102 = vector.broadcast %81 : vector<1x32xf32> to vector<8x32xf32>
    %103 = arith.addf %101, %102 : vector<8x32xf32>
    %104 = arith.truncf %103 : vector<8x32xf32> to vector<8x32xbf16>
    %c0_32 = arith.constant 0 : index
    %c0_33 = arith.constant 0 : index
    %c0_34 = arith.constant 0 : index
    %105 = vector.load %arg6[%c0_32, %c0_33, %c0_34] : memref<2x32x64xbf16, #tpu.memory_space<vmem>>, vector<1x32x64xbf16>
    %106 = vector.shape_cast %105 : vector<1x32x64xbf16> to vector<32x64xbf16>
    %cst_35 = arith.constant dense<0.000000e+00> : vector<8x64xf32>
    %107 = tpu.matmul %104, %106, %cst_35 {dimension_numbers = #tpu.dot_dimension_numbers<[1], [0], [0], [1], [0, 0, 1, 1], [], []>} : vector<8x32xbf16>, vector<32x64xbf16>, vector<8x64xf32> -> vector<8x64xf32>
    %c0_36 = arith.constant 0 : index
    %c0_37 = arith.constant 0 : index
    %c0_38 = arith.constant 0 : index
    %108 = vector.load %arg7[%c0_36, %c0_37, %c0_38] : memref<2x1x64xf32, #tpu.memory_space<vmem>>, vector<1x1x64xf32>
    %109 = vector.shape_cast %108 : vector<1x1x64xf32> to vector<1x64xf32>
    %110 = vector.broadcast %109 : vector<1x64xf32> to vector<8x64xf32>
    %111 = arith.addf %107, %110 : vector<8x64xf32>
    %cst_39 = arith.constant 0.000000e+00 : f32
    %112 = vector.broadcast %cst_39 : f32 to vector<8x64xf32>
    %113 = arith.maximumf %111, %112 : vector<8x64xf32>
    %114 = arith.truncf %113 : vector<8x64xf32> to vector<8x64xbf16>
    %c0_40 = arith.constant 0 : index
    %c0_41 = arith.constant 0 : index
    %c0_42 = arith.constant 0 : index
    %115 = vector.load %arg8[%c0_40, %c0_41, %c0_42] : memref<2x64x32xbf16, #tpu.memory_space<vmem>>, vector<1x64x32xbf16>
    %116 = vector.shape_cast %115 : vector<1x64x32xbf16> to vector<64x32xbf16>
    %cst_43 = arith.constant dense<0.000000e+00> : vector<8x32xf32>
    %117 = tpu.matmul %114, %116, %cst_43 {dimension_numbers = #tpu.dot_dimension_numbers<[1], [0], [0], [1], [0, 0, 1, 1], [], []>} : vector<8x64xbf16>, vector<64x32xbf16>, vector<8x32xf32> -> vector<8x32xf32>
    %c0_44 = arith.constant 0 : index
    %c0_45 = arith.constant 0 : index
    %c0_46 = arith.constant 0 : index
    %118 = vector.load %arg9[%c0_44, %c0_45, %c0_46] : memref<2x1x32xf32, #tpu.memory_space<vmem>>, vector<1x1x32xf32>
    %119 = vector.shape_cast %118 : vector<1x1x32xf32> to vector<1x32xf32>
    %120 = vector.broadcast %119 : vector<1x32xf32> to vector<8x32xf32>
    %121 = arith.addf %117, %120 : vector<8x32xf32>
    %122 = arith.addf %103, %121 : vector<8x32xf32>
    %c0_47 = arith.constant 0 : index
    %c0_48 = arith.constant 0 : index
    %c0_49 = arith.constant 0 : index
    %123 = vector.load %arg12[%c0_47, %c0_48, %c0_49] : memref<2x1x32xf32, #tpu.memory_space<vmem>>, vector<1x1x32xf32>
    %124 = vector.shape_cast %123 : vector<1x1x32xf32> to vector<1x32xf32>
    %c0_50 = arith.constant 0 : index
    %c0_51 = arith.constant 0 : index
    %c0_52 = arith.constant 0 : index
    %125 = vector.load %arg13[%c0_50, %c0_51, %c0_52] : memref<2x1x32xf32, #tpu.memory_space<vmem>>, vector<1x1x32xf32>
    %126 = vector.shape_cast %125 : vector<1x1x32xf32> to vector<1x32xf32>
    %cst_53 = arith.constant dense<0.000000e+00> : vector<8xf32>
    %127 = vector.multi_reduction <add>, %122, %cst_53 [1] : vector<8x32xf32> to vector<8xf32>
    %128 = vector.shape_cast %127 : vector<8xf32> to vector<8x1xf32>
    %cst_54 = arith.constant 3.200000e+01 : f32
    %129 = vector.broadcast %cst_54 : f32 to vector<8x1xf32>
    %130 = arith.divf %128, %129 : vector<8x1xf32>
    %131 = vector.broadcast %130 : vector<8x1xf32> to vector<8x32xf32>
    %132 = arith.subf %122, %131 : vector<8x32xf32>
    %133 = arith.mulf %132, %132 : vector<8x32xf32>
    %cst_55 = arith.constant dense<0.000000e+00> : vector<8xf32>
    %134 = vector.multi_reduction <add>, %133, %cst_55 [1] : vector<8x32xf32> to vector<8xf32>
    %135 = vector.shape_cast %134 : vector<8xf32> to vector<8x1xf32>
    %cst_56 = arith.constant 3.200000e+01 : f32
    %136 = vector.broadcast %cst_56 : f32 to vector<8x1xf32>
    %137 = arith.divf %135, %136 : vector<8x1xf32>
    %138 = vector.broadcast %130 : vector<8x1xf32> to vector<8x32xf32>
    %139 = arith.subf %122, %138 : vector<8x32xf32>
    %cst_57 = arith.constant 9.99999974E-6 : f32
    %140 = vector.broadcast %cst_57 : f32 to vector<8x1xf32>
    %141 = arith.addf %137, %140 : vector<8x1xf32>
    %142 = math.rsqrt %141 : vector<8x1xf32>
    %143 = vector.broadcast %142 : vector<8x1xf32> to vector<8x32xf32>
    %144 = arith.mulf %139, %143 : vector<8x32xf32>
    %145 = vector.broadcast %124 : vector<1x32xf32> to vector<8x32xf32>
    %146 = arith.mulf %144, %145 : vector<8x32xf32>
    %147 = vector.broadcast %126 : vector<1x32xf32> to vector<8x32xf32>
    %148 = arith.addf %146, %147 : vector<8x32xf32>
    %149 = arith.truncf %148 : vector<8x32xf32> to vector<8x32xbf16>
    %c1 = arith.constant 1 : index
    %c0_58 = arith.constant 0 : index
    %c0_59 = arith.constant 0 : index
    %150 = vector.load %arg2[%c1, %c0_58, %c0_59] : memref<2x32x96xbf16, #tpu.memory_space<vmem>>, vector<1x32x96xbf16>
    %151 = vector.shape_cast %150 : vector<1x32x96xbf16> to vector<32x96xbf16>
    %cst_60 = arith.constant dense<0.000000e+00> : vector<8x96xf32>
    %152 = tpu.matmul %149, %151, %cst_60 {dimension_numbers = #tpu.dot_dimension_numbers<[1], [0], [0], [1], [0, 0, 1, 1], [], []>} : vector<8x32xbf16>, vector<32x96xbf16>, vector<8x96xf32> -> vector<8x96xf32>
    %c1_61 = arith.constant 1 : index
    %c0_62 = arith.constant 0 : index
    %c0_63 = arith.constant 0 : index
    %153 = vector.load %arg3[%c1_61, %c0_62, %c0_63] : memref<2x1x96xf32, #tpu.memory_space<vmem>>, vector<1x1x96xf32>
    %154 = vector.shape_cast %153 : vector<1x1x96xf32> to vector<1x96xf32>
    %155 = vector.broadcast %154 : vector<1x96xf32> to vector<8x96xf32>
    %156 = arith.addf %152, %155 : vector<8x96xf32>
    %157 = arith.truncf %156 : vector<8x96xf32> to vector<8x96xbf16>
    %158 = vector.extract_strided_slice %157 {offsets = [0, 0], sizes = [8, 8], strides = [1, 1]} : vector<8x96xbf16> to vector<8x8xbf16>
    %159 = vector.extract_strided_slice %157 {offsets = [0, 8], sizes = [8, 8], strides = [1, 1]} : vector<8x96xbf16> to vector<8x8xbf16>
    %160 = vector.extract_strided_slice %157 {offsets = [0, 16], sizes = [8, 8], strides = [1, 1]} : vector<8x96xbf16> to vector<8x8xbf16>
    %161 = vector.extract_strided_slice %157 {offsets = [0, 24], sizes = [8, 8], strides = [1, 1]} : vector<8x96xbf16> to vector<8x8xbf16>
    %162 = vector.shape_cast %158 : vector<8x8xbf16> to vector<1x8x8xbf16>
    %163 = vector.shape_cast %159 : vector<8x8xbf16> to vector<1x8x8xbf16>
    %164 = vector.shape_cast %160 : vector<8x8xbf16> to vector<1x8x8xbf16>
    %165 = vector.shape_cast %161 : vector<8x8xbf16> to vector<1x8x8xbf16>
    %166 = tpu.concatenate %162, %163, %164, %165 in 0 : vector<1x8x8xbf16>, vector<1x8x8xbf16>, vector<1x8x8xbf16>, vector<1x8x8xbf16> -> vector<4x8x8xbf16>
    %167 = vector.extract_strided_slice %157 {offsets = [0, 32], sizes = [8, 8], strides = [1, 1]} : vector<8x96xbf16> to vector<8x8xbf16>
    %168 = vector.extract_strided_slice %157 {offsets = [0, 40], sizes = [8, 8], strides = [1, 1]} : vector<8x96xbf16> to vector<8x8xbf16>
    %169 = vector.extract_strided_slice %157 {offsets = [0, 48], sizes = [8, 8], strides = [1, 1]} : vector<8x96xbf16> to vector<8x8xbf16>
    %170 = vector.extract_strided_slice %157 {offsets = [0, 56], sizes = [8, 8], strides = [1, 1]} : vector<8x96xbf16> to vector<8x8xbf16>
    %171 = vector.shape_cast %167 : vector<8x8xbf16> to vector<1x8x8xbf16>
    %172 = vector.shape_cast %168 : vector<8x8xbf16> to vector<1x8x8xbf16>
    %173 = vector.shape_cast %169 : vector<8x8xbf16> to vector<1x8x8xbf16>
    %174 = vector.shape_cast %170 : vector<8x8xbf16> to vector<1x8x8xbf16>
    %175 = tpu.concatenate %171, %172, %173, %174 in 0 : vector<1x8x8xbf16>, vector<1x8x8xbf16>, vector<1x8x8xbf16>, vector<1x8x8xbf16> -> vector<4x8x8xbf16>
    %176 = vector.extract_strided_slice %157 {offsets = [0, 64], sizes = [8, 8], strides = [1, 1]} : vector<8x96xbf16> to vector<8x8xbf16>
    %177 = vector.extract_strided_slice %157 {offsets = [0, 72], sizes = [8, 8], strides = [1, 1]} : vector<8x96xbf16> to vector<8x8xbf16>
    %178 = vector.extract_strided_slice %157 {offsets = [0, 80], sizes = [8, 8], strides = [1, 1]} : vector<8x96xbf16> to vector<8x8xbf16>
    %179 = vector.extract_strided_slice %157 {offsets = [0, 88], sizes = [8, 8], strides = [1, 1]} : vector<8x96xbf16> to vector<8x8xbf16>
    %180 = vector.shape_cast %176 : vector<8x8xbf16> to vector<1x8x8xbf16>
    %181 = vector.shape_cast %177 : vector<8x8xbf16> to vector<1x8x8xbf16>
    %182 = vector.shape_cast %178 : vector<8x8xbf16> to vector<1x8x8xbf16>
    %183 = vector.shape_cast %179 : vector<8x8xbf16> to vector<1x8x8xbf16>
    %184 = tpu.concatenate %180, %181, %182, %183 in 0 : vector<1x8x8xbf16>, vector<1x8x8xbf16>, vector<1x8x8xbf16>, vector<1x8x8xbf16> -> vector<4x8x8xbf16>
    "tpu.trace_start"() <{level = 10 : i32, message = "htd,hsd->hts"}> : () -> ()
    %cst_64 = arith.constant dense<0.000000e+00> : vector<4x8x8xf32>
    %185 = tpu.matmul %166, %175, %cst_64 {dimension_numbers = #tpu.dot_dimension_numbers<[2], [2], [1], [1], [0, 0, 0, 1, 1, 1], [0], [0]>} : vector<4x8x8xbf16>, vector<4x8x8xbf16>, vector<4x8x8xf32> -> vector<4x8x8xf32>
    "tpu.trace_stop"() : () -> ()
    %186 = vector.shape_cast %7 : vector<8x8xf32> to vector<1x8x8xf32>
    %187 = vector.broadcast %186 : vector<1x8x8xf32> to vector<4x8x8xf32>
    %188 = arith.addf %185, %187 : vector<4x8x8xf32>
    %cst_65 = arith.constant dense<0xFF800000> : vector<4x8xf32>
    %189 = vector.multi_reduction <maximumf>, %188, %cst_65 [2] : vector<4x8x8xf32> to vector<4x8xf32>
    %190 = vector.shape_cast %189 : vector<4x8xf32> to vector<4x8x1xf32>
    %191 = vector.broadcast %190 : vector<4x8x1xf32> to vector<4x8x8xf32>
    %192 = arith.subf %188, %191 : vector<4x8x8xf32>
    %193 = math.exp %192 : vector<4x8x8xf32>
    %cst_66 = arith.constant dense<0.000000e+00> : vector<4x8xf32>
    %194 = vector.multi_reduction <add>, %193, %cst_66 [2] : vector<4x8x8xf32> to vector<4x8xf32>
    %195 = vector.shape_cast %194 : vector<4x8xf32> to vector<4x8x1xf32>
    %196 = tpu.reciprocal %195 {approx = true} : vector<4x8x1xf32> -> vector<4x8x1xf32>
    %197 = vector.broadcast %196 : vector<4x8x1xf32> to vector<4x8x8xf32>
    %198 = arith.mulf %193, %197 : vector<4x8x8xf32>
    %199 = arith.truncf %198 : vector<4x8x8xf32> to vector<4x8x8xbf16>
    "tpu.trace_start"() <{level = 10 : i32, message = "hts,hsd->htd"}> : () -> ()
    %cst_67 = arith.constant dense<0.000000e+00> : vector<4x8x8xf32>
    %200 = tpu.matmul %199, %184, %cst_67 {dimension_numbers = #tpu.dot_dimension_numbers<[2], [1], [1], [2], [0, 0, 0, 1, 1, 2], [0], [0]>} : vector<4x8x8xbf16>, vector<4x8x8xbf16>, vector<4x8x8xf32> -> vector<4x8x8xf32>
    "tpu.trace_stop"() : () -> ()
    %201 = vector.extract_strided_slice %200 {offsets = [0, 0, 0], sizes = [1, 8, 8], strides = [1, 1, 1]} : vector<4x8x8xf32> to vector<1x8x8xf32>
    %202 = vector.shape_cast %201 : vector<1x8x8xf32> to vector<8x8xf32>
    %203 = vector.extract_strided_slice %200 {offsets = [1, 0, 0], sizes = [1, 8, 8], strides = [1, 1, 1]} : vector<4x8x8xf32> to vector<1x8x8xf32>
    %204 = vector.shape_cast %203 : vector<1x8x8xf32> to vector<8x8xf32>
    %205 = vector.extract_strided_slice %200 {offsets = [2, 0, 0], sizes = [1, 8, 8], strides = [1, 1, 1]} : vector<4x8x8xf32> to vector<1x8x8xf32>
    %206 = vector.shape_cast %205 : vector<1x8x8xf32> to vector<8x8xf32>
    %207 = vector.extract_strided_slice %200 {offsets = [3, 0, 0], sizes = [1, 8, 8], strides = [1, 1, 1]} : vector<4x8x8xf32> to vector<1x8x8xf32>
    %208 = vector.shape_cast %207 : vector<1x8x8xf32> to vector<8x8xf32>
    %209 = tpu.concatenate %202, %204, %206, %208 in 1 : vector<8x8xf32>, vector<8x8xf32>, vector<8x8xf32>, vector<8x8xf32> -> vector<8x32xf32>
    %210 = arith.truncf %209 : vector<8x32xf32> to vector<8x32xbf16>
    %c1_68 = arith.constant 1 : index
    %c0_69 = arith.constant 0 : index
    %c0_70 = arith.constant 0 : index
    %211 = vector.load %arg4[%c1_68, %c0_69, %c0_70] : memref<2x32x32xbf16, #tpu.memory_space<vmem>>, vector<1x32x32xbf16>
    %212 = vector.shape_cast %211 : vector<1x32x32xbf16> to vector<32x32xbf16>
    %cst_71 = arith.constant dense<0.000000e+00> : vector<8x32xf32>
    %213 = tpu.matmul %210, %212, %cst_71 {dimension_numbers = #tpu.dot_dimension_numbers<[1], [0], [0], [1], [0, 0, 1, 1], [], []>} : vector<8x32xbf16>, vector<32x32xbf16>, vector<8x32xf32> -> vector<8x32xf32>
    %c1_72 = arith.constant 1 : index
    %c0_73 = arith.constant 0 : index
    %c0_74 = arith.constant 0 : index
    %214 = vector.load %arg5[%c1_72, %c0_73, %c0_74] : memref<2x1x32xf32, #tpu.memory_space<vmem>>, vector<1x1x32xf32>
    %215 = vector.shape_cast %214 : vector<1x1x32xf32> to vector<1x32xf32>
    %216 = vector.broadcast %215 : vector<1x32xf32> to vector<8x32xf32>
    %217 = arith.addf %213, %216 : vector<8x32xf32>
    %218 = arith.addf %148, %217 : vector<8x32xf32>
    %c1_75 = arith.constant 1 : index
    %c0_76 = arith.constant 0 : index
    %c0_77 = arith.constant 0 : index
    %219 = vector.load %arg10[%c1_75, %c0_76, %c0_77] : memref<2x1x32xf32, #tpu.memory_space<vmem>>, vector<1x1x32xf32>
    %220 = vector.shape_cast %219 : vector<1x1x32xf32> to vector<1x32xf32>
    %c1_78 = arith.constant 1 : index
    %c0_79 = arith.constant 0 : index
    %c0_80 = arith.constant 0 : index
    %221 = vector.load %arg11[%c1_78, %c0_79, %c0_80] : memref<2x1x32xf32, #tpu.memory_space<vmem>>, vector<1x1x32xf32>
    %222 = vector.shape_cast %221 : vector<1x1x32xf32> to vector<1x32xf32>
    %cst_81 = arith.constant dense<0.000000e+00> : vector<8xf32>
    %223 = vector.multi_reduction <add>, %218, %cst_81 [1] : vector<8x32xf32> to vector<8xf32>
    %224 = vector.shape_cast %223 : vector<8xf32> to vector<8x1xf32>
    %cst_82 = arith.constant 3.200000e+01 : f32
    %225 = vector.broadcast %cst_82 : f32 to vector<8x1xf32>
    %226 = arith.divf %224, %225 : vector<8x1xf32>
    %227 = vector.broadcast %226 : vector<8x1xf32> to vector<8x32xf32>
    %228 = arith.subf %218, %227 : vector<8x32xf32>
    %229 = arith.mulf %228, %228 : vector<8x32xf32>
    %cst_83 = arith.constant dense<0.000000e+00> : vector<8xf32>
    %230 = vector.multi_reduction <add>, %229, %cst_83 [1] : vector<8x32xf32> to vector<8xf32>
    %231 = vector.shape_cast %230 : vector<8xf32> to vector<8x1xf32>
    %cst_84 = arith.constant 3.200000e+01 : f32
    %232 = vector.broadcast %cst_84 : f32 to vector<8x1xf32>
    %233 = arith.divf %231, %232 : vector<8x1xf32>
    %234 = vector.broadcast %226 : vector<8x1xf32> to vector<8x32xf32>
    %235 = arith.subf %218, %234 : vector<8x32xf32>
    %cst_85 = arith.constant 9.99999974E-6 : f32
    %236 = vector.broadcast %cst_85 : f32 to vector<8x1xf32>
    %237 = arith.addf %233, %236 : vector<8x1xf32>
    %238 = math.rsqrt %237 : vector<8x1xf32>
    %239 = vector.broadcast %238 : vector<8x1xf32> to vector<8x32xf32>
    %240 = arith.mulf %235, %239 : vector<8x32xf32>
    %241 = vector.broadcast %220 : vector<1x32xf32> to vector<8x32xf32>
    %242 = arith.mulf %240, %241 : vector<8x32xf32>
    %243 = vector.broadcast %222 : vector<1x32xf32> to vector<8x32xf32>
    %244 = arith.addf %242, %243 : vector<8x32xf32>
    %245 = arith.truncf %244 : vector<8x32xf32> to vector<8x32xbf16>
    %c1_86 = arith.constant 1 : index
    %c0_87 = arith.constant 0 : index
    %c0_88 = arith.constant 0 : index
    %246 = vector.load %arg6[%c1_86, %c0_87, %c0_88] : memref<2x32x64xbf16, #tpu.memory_space<vmem>>, vector<1x32x64xbf16>
    %247 = vector.shape_cast %246 : vector<1x32x64xbf16> to vector<32x64xbf16>
    %cst_89 = arith.constant dense<0.000000e+00> : vector<8x64xf32>
    %248 = tpu.matmul %245, %247, %cst_89 {dimension_numbers = #tpu.dot_dimension_numbers<[1], [0], [0], [1], [0, 0, 1, 1], [], []>} : vector<8x32xbf16>, vector<32x64xbf16>, vector<8x64xf32> -> vector<8x64xf32>
    %c1_90 = arith.constant 1 : index
    %c0_91 = arith.constant 0 : index
    %c0_92 = arith.constant 0 : index
    %249 = vector.load %arg7[%c1_90, %c0_91, %c0_92] : memref<2x1x64xf32, #tpu.memory_space<vmem>>, vector<1x1x64xf32>
    %250 = vector.shape_cast %249 : vector<1x1x64xf32> to vector<1x64xf32>
    %251 = vector.broadcast %250 : vector<1x64xf32> to vector<8x64xf32>
    %252 = arith.addf %248, %251 : vector<8x64xf32>
    %cst_93 = arith.constant 0.000000e+00 : f32
    %253 = vector.broadcast %cst_93 : f32 to vector<8x64xf32>
    %254 = arith.maximumf %252, %253 : vector<8x64xf32>
    %255 = arith.truncf %254 : vector<8x64xf32> to vector<8x64xbf16>
    %c1_94 = arith.constant 1 : index
    %c0_95 = arith.constant 0 : index
    %c0_96 = arith.constant 0 : index
    %256 = vector.load %arg8[%c1_94, %c0_95, %c0_96] : memref<2x64x32xbf16, #tpu.memory_space<vmem>>, vector<1x64x32xbf16>
    %257 = vector.shape_cast %256 : vector<1x64x32xbf16> to vector<64x32xbf16>
    %cst_97 = arith.constant dense<0.000000e+00> : vector<8x32xf32>
    %258 = tpu.matmul %255, %257, %cst_97 {dimension_numbers = #tpu.dot_dimension_numbers<[1], [0], [0], [1], [0, 0, 1, 1], [], []>} : vector<8x64xbf16>, vector<64x32xbf16>, vector<8x32xf32> -> vector<8x32xf32>
    %c1_98 = arith.constant 1 : index
    %c0_99 = arith.constant 0 : index
    %c0_100 = arith.constant 0 : index
    %259 = vector.load %arg9[%c1_98, %c0_99, %c0_100] : memref<2x1x32xf32, #tpu.memory_space<vmem>>, vector<1x1x32xf32>
    %260 = vector.shape_cast %259 : vector<1x1x32xf32> to vector<1x32xf32>
    %261 = vector.broadcast %260 : vector<1x32xf32> to vector<8x32xf32>
    %262 = arith.addf %258, %261 : vector<8x32xf32>
    %263 = arith.addf %244, %262 : vector<8x32xf32>
    %c1_101 = arith.constant 1 : index
    %c0_102 = arith.constant 0 : index
    %c0_103 = arith.constant 0 : index
    %264 = vector.load %arg12[%c1_101, %c0_102, %c0_103] : memref<2x1x32xf32, #tpu.memory_space<vmem>>, vector<1x1x32xf32>
    %265 = vector.shape_cast %264 : vector<1x1x32xf32> to vector<1x32xf32>
    %c1_104 = arith.constant 1 : index
    %c0_105 = arith.constant 0 : index
    %c0_106 = arith.constant 0 : index
    %266 = vector.load %arg13[%c1_104, %c0_105, %c0_106] : memref<2x1x32xf32, #tpu.memory_space<vmem>>, vector<1x1x32xf32>
    %267 = vector.shape_cast %266 : vector<1x1x32xf32> to vector<1x32xf32>
    %cst_107 = arith.constant dense<0.000000e+00> : vector<8xf32>
    %268 = vector.multi_reduction <add>, %263, %cst_107 [1] : vector<8x32xf32> to vector<8xf32>
    %269 = vector.shape_cast %268 : vector<8xf32> to vector<8x1xf32>
    %cst_108 = arith.constant 3.200000e+01 : f32
    %270 = vector.broadcast %cst_108 : f32 to vector<8x1xf32>
    %271 = arith.divf %269, %270 : vector<8x1xf32>
    %272 = vector.broadcast %271 : vector<8x1xf32> to vector<8x32xf32>
    %273 = arith.subf %263, %272 : vector<8x32xf32>
    %274 = arith.mulf %273, %273 : vector<8x32xf32>
    %cst_109 = arith.constant dense<0.000000e+00> : vector<8xf32>
    %275 = vector.multi_reduction <add>, %274, %cst_109 [1] : vector<8x32xf32> to vector<8xf32>
    %276 = vector.shape_cast %275 : vector<8xf32> to vector<8x1xf32>
    %cst_110 = arith.constant 3.200000e+01 : f32
    %277 = vector.broadcast %cst_110 : f32 to vector<8x1xf32>
    %278 = arith.divf %276, %277 : vector<8x1xf32>
    %279 = vector.broadcast %271 : vector<8x1xf32> to vector<8x32xf32>
    %280 = arith.subf %263, %279 : vector<8x32xf32>
    %cst_111 = arith.constant 9.99999974E-6 : f32
    %281 = vector.broadcast %cst_111 : f32 to vector<8x1xf32>
    %282 = arith.addf %278, %281 : vector<8x1xf32>
    %283 = math.rsqrt %282 : vector<8x1xf32>
    %284 = vector.broadcast %283 : vector<8x1xf32> to vector<8x32xf32>
    %285 = arith.mulf %280, %284 : vector<8x32xf32>
    %286 = vector.broadcast %265 : vector<1x32xf32> to vector<8x32xf32>
    %287 = arith.mulf %285, %286 : vector<8x32xf32>
    %288 = vector.broadcast %267 : vector<1x32xf32> to vector<8x32xf32>
    %289 = arith.addf %287, %288 : vector<8x32xf32>
    %290 = arith.truncf %289 : vector<8x32xf32> to vector<8x32xbf16>
    %c0_112 = arith.constant 0 : index
    %c0_113 = arith.constant 0 : index
    %291 = vector.load %arg14[%c0_112, %c0_113] : memref<32x128xbf16, #tpu.memory_space<vmem>>, vector<32x128xbf16>
    %cst_114 = arith.constant dense<0.000000e+00> : vector<8x128xf32>
    %292 = tpu.matmul %290, %291, %cst_114 {dimension_numbers = #tpu.dot_dimension_numbers<[1], [0], [0], [1], [0, 0, 1, 1], [], []>} : vector<8x32xbf16>, vector<32x128xbf16>, vector<8x128xf32> -> vector<8x128xf32>
    %c0_115 = arith.constant 0 : index
    %c0_116 = arith.constant 0 : index
    %293 = vector.load %arg15[%c0_115, %c0_116] : memref<1x128xf32, #tpu.memory_space<vmem>>, vector<1x128xf32>
    %294 = vector.broadcast %293 : vector<1x128xf32> to vector<8x128xf32>
    %295 = arith.addf %292, %294 : vector<8x128xf32>
    %c0_117 = arith.constant 0 : index
    %c0_118 = arith.constant 0 : index
    %c0_119 = arith.constant 0 : index
    %296 = vector.load %arg16[%c0_117, %c0_118, %c0_119] : memref<1x8x128xf32, #tpu.memory_space<vmem>>, vector<1x8x128xf32>
    %297 = vector.shape_cast %296 : vector<1x8x128xf32> to vector<8x128xf32>
    %298 = vector.shape_cast %295 : vector<8x128xf32> to vector<1x8x128xf32>
    tpu.vector_store %arg16[%c0_117, %c0_118, %c0_119], %298 {strides = array<i32>} : memref<1x8x128xf32, #tpu.memory_space<vmem>>, vector<1x8x128xf32>,
    return
  }
  func.func @transform_0(%arg0: i32) -> (i32, i32, i32) {
    %c0_i32 = arith.constant 0 : i32
    %c0_i32_0 = arith.constant 0 : i32
    %c0_i32_1 = arith.constant 0 : i32
    return %arg0, %c0_i32, %c0_i32_0 : i32, i32, i32
  }
  func.func @transform_1(%arg0: i32) -> (i32, i32, i32) {
    %c0_i32 = arith.constant 0 : i32
    %c0_i32_0 = arith.constant 0 : i32
    %c0_i32_1 = arith.constant 0 : i32
    %c0_i32_2 = arith.constant 0 : i32
    return %c0_i32, %c0_i32_0, %c0_i32_1 : i32, i32, i32
  }
  func.func @transform_2(%arg0: i32) -> (i32, i32, i32) {
    %c0_i32 = arith.constant 0 : i32
    %c0_i32_0 = arith.constant 0 : i32
    %c0_i32_1 = arith.constant 0 : i32
    %c0_i32_2 = arith.constant 0 : i32
    return %c0_i32, %c0_i32_0, %c0_i32_1 : i32, i32, i32
  }
  func.func @transform_3(%arg0: i32) -> (i32, i32, i32) {
    %c0_i32 = arith.constant 0 : i32
    %c0_i32_0 = arith.constant 0 : i32
    %c0_i32_1 = arith.constant 0 : i32
    %c0_i32_2 = arith.constant 0 : i32
    return %c0_i32, %c0_i32_0, %c0_i32_1 : i32, i32, i32
  }
  func.func @transform_4(%arg0: i32) -> (i32, i32, i32) {
    %c0_i32 = arith.constant 0 : i32
    %c0_i32_0 = arith.constant 0 : i32
    %c0_i32_1 = arith.constant 0 : i32
    %c0_i32_2 = arith.constant 0 : i32
    return %c0_i32, %c0_i32_0, %c0_i32_1 : i32, i32, i32
  }
  func.func @transform_5(%arg0: i32) -> (i32, i32, i32) {
    %c0_i32 = arith.constant 0 : i32
    %c0_i32_0 = arith.constant 0 : i32
    %c0_i32_1 = arith.constant 0 : i32
    %c0_i32_2 = arith.constant 0 : i32
    return %c0_i32, %c0_i32_0, %c0_i32_1 : i32, i32, i32
  }
  func.func @transform_6(%arg0: i32) -> (i32, i32, i32) {
    %c0_i32 = arith.constant 0 : i32
    %c0_i32_0 = arith.constant 0 : i32
    %c0_i32_1 = arith.constant 0 : i32
    %c0_i32_2 = arith.constant 0 : i32
    return %c0_i32, %c0_i32_0, %c0_i32_1 : i32, i32, i32
  }
  func.func @transform_7(%arg0: i32) -> (i32, i32, i32) {
    %c0_i32 = arith.constant 0 : i32
    %c0_i32_0 = arith.constant 0 : i32
    %c0_i32_1 = arith.constant 0 : i32
    %c0_i32_2 = arith.constant 0 : i32
    return %c0_i32, %c0_i32_0, %c0_i32_1 : i32, i32, i32
  }
  func.func @transform_8(%arg0: i32) -> (i32, i32, i32) {
    %c0_i32 = arith.constant 0 : i32
    %c0_i32_0 = arith.constant 0 : i32
    %c0_i32_1 = arith.constant 0 : i32
    %c0_i32_2 = arith.constant 0 : i32
    return %c0_i32, %c0_i32_0, %c0_i32_1 : i32, i32, i32
  }
  func.func @transform_9(%arg0: i32) -> (i32, i32, i32) {
    %c0_i32 = arith.constant 0 : i32
    %c0_i32_0 = arith.constant 0 : i32
    %c0_i32_1 = arith.constant 0 : i32
    %c0_i32_2 = arith.constant 0 : i32
    return %c0_i32, %c0_i32_0, %c0_i32_1 : i32, i32, i32
  }
  func.func @transform_10(%arg0: i32) -> (i32, i32, i32) {
    %c0_i32 = arith.constant 0 : i32
    %c0_i32_0 = arith.constant 0 : i32
    %c0_i32_1 = arith.constant 0 : i32
    %c0_i32_2 = arith.constant 0 : i32
    return %c0_i32, %c0_i32_0, %c0_i32_1 : i32, i32, i32
  }
  func.func @transform_11(%arg0: i32) -> (i32, i32, i32) {
    %c0_i32 = arith.constant 0 : i32
    %c0_i32_0 = arith.constant 0 : i32
    %c0_i32_1 = arith.constant 0 : i32
    %c0_i32_2 = arith.constant 0 : i32
    return %c0_i32, %c0_i32_0, %c0_i32_1 : i32, i32, i32
  }
  func.func @transform_12(%arg0: i32) -> (i32, i32, i32) {
    %c0_i32 = arith.constant 0 : i32
    %c0_i32_0 = arith.constant 0 : i32
    %c0_i32_1 = arith.constant 0 : i32
    %c0_i32_2 = arith.constant 0 : i32
    return %c0_i32, %c0_i32_0, %c0_i32_1 : i32, i32, i32
  }
  func.func @transform_13(%arg0: i32) -> (i32, i32) {
    %c0_i32 = arith.constant 0 : i32
    %c0_i32_0 = arith.constant 0 : i32
    %c0_i32_1 = arith.constant 0 : i32
    return %c0_i32, %c0_i32_0 : i32, i32
  }
  func.func @transform_14(%arg0: i32) -> (i32, i32) {
    %c0_i32 = arith.constant 0 : i32
    %c0_i32_0 = arith.constant 0 : i32
    %c0_i32_1 = arith.constant 0 : i32
    return %c0_i32, %c0_i32_0 : i32, i32
  }
  func.func @transform_15(%arg0: i32) -> (i32, i32, i32) {
    %c0_i32 = arith.constant 0 : i32
    %c0_i32_0 = arith.constant 0 : i32
    %c0_i32_1 = arith.constant 0 : i32
    return %arg0, %c0_i32, %c0_i32_0 : i32, i32, i32
  }
}

</mosaic_0001>

<bundles_post_ra>
// kernel: tpu_custom_call.1
= control target key start
LH: loop header
LB: loop body
LE: loop exit
PB: predicated region body
PF: predicated region fallthrough
CT: control target
= control target key end

     0   :  { %s2806_s0 = inlined_call_operand.hbm [shape: f32[2,8,32], index: 0, kind: input, shape index: {}]   ;;  %s2807_s1 = inlined_call_operand.vmem [shape: bf16[2,32,96], index: 1, kind: input, shape index: {}]   ;;  %s2808_s2 = inlined_call_operand.hbm [shape: f32[2,1,96], index: 2, kind: input, shape index: {}]   ;;  %s2809_s3 = inlined_call_operand.vmem [shape: bf16[2,32,32], index: 3, kind: input, shape index: {}]   ;;  %s2810_s4 = inlined_call_operand.vmem [shape: f32[2,1,32], index: 4, kind: input, shape index: {}]   ;;  %s2811_s5 = inlined_call_operand.vmem [shape: bf16[2,32,64], index: 5, kind: input, shape index: {}]   ;;  %s2812_s6 = inlined_call_operand.vmem [shape: f32[2,1,64], index: 6, kind: input, shape index: {}]   ;;  %s2813_s7 = inlined_call_operand.vmem [shape: bf16[2,64,32], index: 7, kind: input, shape index: {}]   ;;  %s2814_s8 = inlined_call_operand.vmem [shape: f32[2,1,32], index: 8, kind: input, shape index: {}]   ;;  %s2815_s9 = inlined_call_operand.hbm [shape: f32[2,1,32], index: 9, kind: input, shape index: {}]   ;;  %s2816_s10 = inlined_call_operand.vmem [shape: f32[2,1,32], index: 10, kind: input, shape index: {}]   ;;  %s2817_s11 = inlined_call_operand.hbm [shape: f32[2,1,32], index: 11, kind: input, shape index: {}]   ;;  %s2818_s12 = inlined_call_operand.vmem [shape: f32[2,1,32], index: 12, kind: input, shape index: {}]   ;;  %s2819_s13 = inlined_call_operand.hbm [shape: bf16[32,128], index: 13, kind: input, shape index: {}]   ;;  %s2820_s14 = inlined_call_operand.vmem [shape: f32[1,128], index: 14, kind: input, shape index: {}]   ;;  %s2821_s15 = inlined_call_operand.hbm [shape: f32[2,8,128], index: 15, kind: output, shape index: {}]  }
   0x1   :  { %2829 = sst [smem:[#allocation19_spill]] %s2808_s2 }
   0x2   :  { %2830 = sst [smem:[#allocation20_spill]] %s2815_s9 }
   0x3   :  { %2831 = sst [smem:[#allocation21_spill]] %s2817_s11 }
   0x4   :  { %2832 = sst [smem:[#allocation22_spill]] %s2818_s12 }
   0x5   :  { %2833 = sst [smem:[#allocation23_spill]] %s2819_s13 }
   0x6   :  { %2834 = sst [smem:[#allocation24_spill]] %s2820_s14 }
   0x7   :  { %2835 = sst [smem:[#allocation25_spill]] %s2821_s15 }
   0x8   :  { %20 = vsyncpa [#allocation3], 0 }
   0x9   :  { %22 = vsyncpa [#allocation3 + $0x1], 0 }
   0xa   :  { %23 = vsyncpa [#allocation6], 0 }
   0xb   :  { %24 = vsyncpa [#allocation9], 0 }
   0xc   :  { %25 = vsyncpa [#allocation4], 0 }
   0xd   :  { %27 = vsyncpa [#allocation4 + $0x1], 0  ;;  %s2393_s18 = smov 0   ;;  %s2395_s19 = smov 0  }
   0xe   :  { %s2397_s20 = smov 0   ;;  %s2399_s21 = smov 0  }
   0xf LB: > { %2836 = sst [smem:[#allocation16_spill]] %s2289_s20  ;;  %s2417_s25 = sadd.s32 4294967295, %s2293_s21   ;;  %s2293_s21 = sphi %s2399_s21, %s2856_s21   ;;  %s2289_s20 = sphi %s2397_s20, %s2858_s20   ;;  %s2285_s19 = sphi %s2395_s19, %s2860_s19   ;;  %s2281_s18 = sphi %s2393_s18, %s2859_s18  }
  0x10   : > { %s2837_s2 = sld [smem:[#allocation19_spill]]  ;;  %p1730_p0 = scmp.ge.s32.totalorder %s2293_s21, 1 }
  0x11   : > { %p54_p1 = scmp.eq.s32.totalorder %s2417_s25, 0  ;;  %p384_p2 = scmp.lt.s32.totalorder %s2293_s21, 3 }
  0x12   : > { %s2295_s27 = smov [#allocation5]   ;;  %s2839_s11 = sld [smem:[#allocation21_spill]] }
  0x13   : > { %p2422_p3 = pnand %p1730_p0, %p384_p2  ;;  %s400_s28 = sshll.u32 %s2295_s27, 4  ;;  %s401_s28 = int_to_ptr.vmem [resolvable:$true] %s400_s28 }
  0x14   : > { %s2841_s9 = sld [smem:[#allocation20_spill]]  ;;  %s2297_s15 = smov 16  }
  0x15   : > { %p1929_p4 = pneg %p2422_p3  ;;  %s2298_s12 = smov 1  }
  0x16   : > { %s398_s24 = sshll.u32 %s2837_s2, 4  ;;  %s2296_s2 = smov [#allocation8]   ;;  %s399_s24 = int_to_ptr.hbm [resolvable:$true] %s398_s24 }
  0x17   : > { %p2434_p6 = pnand %p1929_p4, %p54_p1  ;;  %s449_s14 = sshll.u32 %s2296_s2, 4  ;;  %s450_s14 = int_to_ptr.vmem [resolvable:$true] %s449_s14 }
  0x18   : > { %s447_s16 = sshll.u32 %s2839_s11, 4  ;;  %s2842_s13 = sld [smem:[#allocation23_spill]]  ;;  %s448_s16 = int_to_ptr.hbm [resolvable:$true] %s447_s16 }
  0x19   : > { %1932 = dma.hbm_to_vmem [thread:$0]  (!%p2434_p6), %s399_s24, 32, %s401_s28, [#allocation6], %s2297_s15, %s2297_s15, %s2298_s12  }
  0x1a   : > { %s430_s27 = sshll.u32 %s2841_s9, 4  ;;  %s2299_s23 = smov [#allocation7]   ;;  %s431_s27 = int_to_ptr.hbm [resolvable:$true] %s430_s27 }
  0x1b   : > { %1938 = dma.hbm_to_vmem [thread:$0]  (!%p2434_p6), %s448_s16, 32, %s450_s14, [#allocation9], %s2297_s15, %s2297_s15, %s2298_s12  }
  0x1c   : > { %s432_s2 = sshll.u32 %s2299_s23, 4  ;;  %s2300_s24 = smov [#allocation10]   ;;  %s433_s2 = int_to_ptr.vmem [resolvable:$true] %s432_s2 }
  0x1d   : > { %1935 = dma.hbm_to_vmem [thread:$0]  (!%p2434_p6), %s431_s27, 32, %s433_s2, [#allocation6], %s2297_s15, %s2297_s15, %s2298_s12  }
  0x1e   : > { %s464_s22 = sshll.u32 %s2842_s13, 4  ;;  %s466_s14 = sshll.u32 %s2300_s24, 4  ;;  %s465_s22 = int_to_ptr.hbm [resolvable:$true] %s464_s22  ;;  %s467_s14 = int_to_ptr.vmem [resolvable:$true] %s466_s14 }
  0x1f   : > { %s2301_s28 = smov 64   ;;  %s2302_s16 = smov 4  }
  0x20   : > { %1941 = dma.hbm_to_vmem [thread:$0]  (!%p2434_p6), %s465_s22, 256, %s467_s14, [#allocation9], %s2301_s28, %s2301_s28, %s2302_s16  }
  0x21   : > { %s1729_s29 = sadd.s32 4294967294, %s2293_s21   ;;  %s2454_s30 = sadd.s32 1, %s2293_s21  }
  0x22   : > { %2843 = sst [smem:[#allocation17_spill]] %s2454_s30  ;;  %s37_s23 = ssub.s32 %s2293_s21, %s2454_s30 }
  0x23   : > { %s40_s9 = sadd.s32 1, %s2289_s20  ;;  %p38_p7 = scmp.eq.s32.totalorder %s37_s23, 0 }
  0x24   : > { %p47_p8 = scmp.ne.s32.totalorder %s2289_s20, %s2285_s19  ;;  %p48_p9 = scmp.eq.s32.totalorder %s2293_s21, 0 }
  0x25   : > { %p53_p10 = scmp.ne.s32.totalorder %s2285_s19, %s2281_s18  ;;  %p371_p13 = scmp.eq.s32.totalorder %s2417_s25, 1 }
  0x26   : > { %s2465_s12 = scalar_select %p38_p7, %s2289_s20, %s40_s9  }
  0x27   : > { %p2467_p11 = por %p48_p9, %p47_p8  ;;  %p2473_p12 = por %p54_p1, %p53_p10 }
  0x28   : > { %2844 = sst [smem:[#allocation18_spill]] %s2465_s12  ;;  %p377_p0 = scmp.eq.s32.totalorder %s1729_s29, 1 }
  0x29   : > { %p1954_p2 = scmp.lt.s32.totalorder %s2293_s21, 2  ;;  %s483_s27 = sand.u32 1, %s2289_s20  }
  0x2a   : > { %p2480_p4 = por %p371_p13, %p47_p8  ;;  %p2484_p6 = por %p377_p0, %p53_p10 }
  0x2b   : > { %s1736_s2 = sshll.u32 %s483_s27, 3  ;;  %s1737_s24 = sshll.u32 %s2293_s21, 3 }
  0x2c   : > { %s491_s16 = scalar_lea.hbm %s2806_s0, %s1737_s24  ;;  %s487_s23 = scalar_lea.vmem [#allocation2], %s1736_s2 }
  0x2d   : > { %s495_s11 = sshll.u32 %s487_s23, 4  ;;  %s493_s13 = sshll.u32 %s491_s16, 4  ;;  %s496_s11 = int_to_ptr.vmem [resolvable:$true] %s495_s11  ;;  %s494_s13 = int_to_ptr.hbm [resolvable:$true] %s493_s13 }
  0x2e   : > { %p2494_p7 = pnand %p1954_p2, %p2467_p11  ;;  %s484_s12 = scalar_lea.sflag [#allocation3], %s483_s27 }
  0x2f   : > { %s2189_s20 = sshra.s32 %s494_s13, 4  ;;  %s2196_s14 = scalar_lea.hbm %s2806_s0, 16  ;;  %s2190_s20 = int_to_ptr.hbm [resolvable:$true] %s2189_s20 }
  0x30   : > { %s2191_s30 = scalar_lea.hbm %s2190_s20, 8  ;;  %p2193_p9 = pneg %p2494_p7 }
  0x31   : > { %p2192_p8 = scmp.ne.s32.totalorder %s2190_s20, %s2191_s30  ;;  %p2197_p11 = scmp.lt.s32.totalorder %s2190_s20, %s2806_s0 }
  0x32   : > { %p2198_p0 = scmp.lt.s32.totalorder %s2196_s14, %s2191_s30 }
  0x33   : > { %p2194_p10 = pnand %p2193_p9, %p2192_p8 }
  0x34   : > { %p2199_p2 = por %p2198_p0, %p2197_p11 }
  0x35   : > { %p2195_p13 = pneg %p2194_p10 }
  0x37   : > { %p2200_p5 = pnand %p2199_p2, %p2195_p13 }
  0x39   : > { %2203 = shalt.err (!%p2200_p5)
}
  0x3a   : > { %1945 = dma.hbm_to_vmem [thread:$0]  (!%p2494_p7), %s494_s13, 128, %s496_s11, %s484_s12  }
  0x3b   : > { %504 = sbr.rel (%p2422_p3) target bundleno = 4134 (0x1026), region = 80  ;;  %s2511_s27 = sand.u32 (!%p2422_p3), 1, %s2285_s19  }
  0x3c   : > { %s2827_s16 = sshll.u32 (!%p2422_p3), %s2511_s27, 3  ;;  %s507_s23 = scalar_lea.sflag (!%p2422_p3), [#allocation3], %s2511_s27 }
  0x3d   : > { %s510_s20 = scalar_lea.vmem (!%p2422_p3), [#allocation2], %s2827_s16 }
  0x40   : > { %2264 = dma.done.wait (%p2473_p12), %s507_s23, 128  }
  0x41   : > { %2266 = vsyncadd (%p2473_p12), %s507_s23, 4294967168 }
  0x42   : > { %2268 = dma.done.wait (%p54_p1), [#allocation6], 64  }
  0x43   : > { %2270 = vsyncadd (%p54_p1), [#allocation6], 4294967232 }
  0x44   : > { %2272 = dma.done.wait (%p54_p1), [#allocation9], 288  }
  0x45   : > { %2274 = vsyncadd (%p54_p1), [#allocation9], 4294967008  ;;  %v1888_v0 = vld [vmem:[%s2807_s1 + $0x8] sm:$0xff]  ;;  %v1887_v1 = vld [vmem:[%s2807_s1] sm:$0xff]  ;;  %vm607_vm0 = vcmask 261120   ;;  %s2303_s12 = smov 104   ;;  %v580_v30 = vlaneseq }
  0x46   : > { %v2535_v2 = vld [vmem:[%s510_s20] sm:$0xff]  ;;  %617 = vmatpush.bf16.msra.mxu0 %v1888_v0  ;;  %v2010_v4 = vld [vmem:[#allocation5] ss:$0 sm:$0xff]  ;;  %s2304_s17 = smov 120   ;;  %s2305_s29 = smov 112   ;;  %vm636_vm1 = vcmask 64512  }
  0x47   : > { %v586_v3 = vpack.c.bf16 %v2535_v2, %v2535_v2  ;;  %s2306_s2 = smov 96   ;;  %v581_v31 = vshrl.u32 %v580_v30, 7  ;;  %v583_v32 = vand.u32 127, %v580_v30  ;;  %v2307_v33 = vmov -1e+30   ;;  %s2308_s24 = smov 64  }
  0x48   : > { %vm778_vm3 = vcmask 1043456   ;;  %s2828_s14 = smov 16   ;;  %s2310_s28 = smov 8   ;;  %vm871_vm4 = vcmask 130048   ;;  %vm873_vm5 = vcmask 195584   ;;  %vm1027_vm10 = vcmask 523264  }
  0x49   : > { %vm584_vm2 = vcmp.le.s32.totalorder %v583_v32, %v581_v31  ;;  %s2311_s15 = smov 24   ;;  %s2850_s23 = sld [smem:[#allocation22_spill]] }
  0x4a   : > { %618 = vmatpush.bf16.msra.mxu0 %v1887_v1  ;;  %v2564_v34 = vsel %vm584_vm2, 0.0, %v2307_v33  ;;  %s1884_s30 = sshll.u32 %s2417_s25, 3  ;;  %s2854_s20 = sshll.u32 %s2511_s27, 3 }
  0x4b   : > { %s577_s16 = scalar_lea.vmem [#allocation11], %s2854_s20  ;;  %s1606_s13 = scalar_lea.sflag [#allocation4], %s2511_s27 }
  0x4d   : > { %1753 = vmatmul.msk.bf16.vlgmr.msra.gmra.mxu0 %vm607_vm0, %v586_v3 }
  0xca   : > { %v620_v5 = vpop.f32.mrf.mxu0 }
  0xcb   : > { %v621_v6 = vadd.f32 %v2010_v4, %v620_v5 }
  0xcd   : > { %v624_v7 = vpack.c.bf16 %v621_v6, %v621_v6 }
  0xcf   : > { %630 = vrot.lane.b32.xlu1 %v624_v7, %s2303_s12  ;;  %626 = vrot.lane.b32.xlu0 %v624_v7, %s2304_s17  ;;  %v632_v9 = vunpack.c.l.b16 %v624_v7 }
  0xd1   : > { %v2543_v10 = vpack.c.b16 %v632_v9, %v632_v9 }
  0xd2   : > { %v622_v8 = vpop.f32.mrf.mxu0 }
  0xd7   : > { %628 = vrot.lane.b32.xlu0 %v624_v7, %s2305_s29 }
  0xdf   : > { %634 = vrot.lane.b32.xlu0 %v2543_v10, %s2306_s2 }
 0x141   : > { %v627_v11 = vpop.permute.xlu0 %626  ;;  %v631_v17 = vpop.permute.xlu1 %630 }
 0x142   : > { %v656_v12 = vunpack.c.l.b16 %v627_v11  ;;  %v702_v18 = vunpack.c.l.b16 %v631_v17 }
 0x144   : > { %v2547_v13 = vpack.c.b16 %v656_v12, %v656_v12  ;;  %v703_v21 = vpack.c.b16 %v702_v18, %v702_v18 }
 0x146   : > { %658 = vrot.lane.b32.xlu1 %v2547_v13, %s2306_s2 }
 0x149   : > { %v629_v14 = vpop.permute.xlu0 %628 }
 0x14a   : > { %v679_v15 = vunpack.c.l.b16 %v629_v14 }
 0x14c   : > { %v2551_v16 = vpack.c.b16 %v679_v15, %v679_v15 }
 0x14e   : > { %681 = vrot.lane.b32.xlu2 %v2551_v16, %s2306_s2 }
 0x151   : > { %v635_v19 = vpop.permute.xlu0 %634 }
 0x152   : > { %v641_v20 = vsel %vm636_vm1, %v635_v19, 0 }
 0x153   : > { %650 = vmatpush.bf16.xpose.msra.mxu1 %v641_v20 }
 0x156   : > { %704 = vrot.lane.b32.xlu2 %v703_v21, %s2306_s2 }
 0x15a   : > { %1754 = vmatmul.msk.bf16.vlgmr.msra.gmra.mxu1 %vm636_vm1, %v624_v7 }
 0x1a8   : > { %v682_v22 = vpop.permute.xlu2 %681 }
 0x1a9   : > { %v687_v23 = vsel %vm636_vm1, %v682_v22, 0 }
 0x1aa   : > { %696 = vmatpush.bf16.xpose.msra.mxu3 %v687_v23 }
 0x1b0   : > { %v705_v24 = vpop.permute.xlu2 %704 }
 0x1b1   : > { %1756 = vmatmul.msk.bf16.vlgmr.msra.gmra.mxu3 %vm636_vm1, %v629_v14  ;;  %v710_v25 = vsel %vm636_vm1, %v705_v24, 0 }
 0x1b2   : > { %719 = vmatpush.bf16.xpose.msrb.mxu0 %v710_v25 }
 0x1b8   : > { %v659_v26 = vpop.permute.xlu1 %658 }
 0x1b9   : > { %1757 = vmatmul.msk.bf16.vlgmr.msrb.gmra.mxu0 %vm636_vm1, %v631_v17  ;;  %v664_v27 = vsel %vm636_vm1, %v659_v26, 0 }
 0x1ba   : > { %673 = vmatpush.bf16.xpose.msra.mxu2 %v664_v27 }
 0x1c1   : > { %1755 = vmatmul.msk.bf16.vlgmr.msra.gmra.mxu2 %vm636_vm1, %v627_v11 }
 0x1d7   : > { %v652_v28 = vpop.f32.mrf.mxu1 }
 0x1d8   : > { %v653_v41 = vadd.f32 %v652_v28, %v2564_v34 }
 0x1da   : > { %v725_v44 = vsel %vm636_vm1, %v653_v41, -inf }
 0x1df   : > { %v654_v29 = vpop.f32.mrf.mxu1 }
 0x234   : > { %v698_v35 = vpop.f32.mrf.mxu3 }
 0x235   : > { %v699_v36 = vadd.f32 %v698_v35, %v2564_v34 }
 0x236   : > { %v721_v37 = vpop.f32.mrf.mxu0 }
 0x237   : > { %v722_v38 = vadd.f32 %v721_v37, %v2564_v34  ;;  %v731_v39 = vsel %vm636_vm1, %v699_v36, -inf }
 0x238   : > { %732 = vmax.xlane.f32.xlu2 %v731_v39  ;;  %v1890_v39 = vld [vmem:[%s2809_s3 + $0x8] sm:$0xff] }
 0x239   : > { %v734_v40 = vsel %vm636_vm1, %v722_v38, -inf }
 0x23a   : > { %735 = vmax.xlane.f32.xlu0 %v734_v40  ;;  %v1889_v40 = vld [vmem:[%s2809_s3] sm:$0xff] }
 0x23c   : > { %v700_v42 = vpop.f32.mrf.mxu3 }
 0x23e   : > { %v723_v43 = vpop.f32.mrf.mxu0 }
 0x240   : > { %726 = vmax.xlane.f32.xlu2 %v725_v44 }
 0x244   : > { %v675_v45 = vpop.f32.mrf.mxu2 }
 0x245   : > { %v676_v46 = vadd.f32 %v675_v45, %v2564_v34 }
 0x247   : > { %v728_v47 = vsel %vm636_vm1, %v676_v46, -inf }
 0x248   : > { %729 = vmax.xlane.f32.xlu1 %v728_v47 }
 0x24c   : > { %v677_v48 = vpop.f32.mrf.mxu2 }
 0x24d   : > { %v2011_v48 = vld [vmem:[%s2810_s4] ss:$0 sm:$0xff] }
 0x2ab   : > { %v733_v49 = vpop.xlane.xlu2 %732 }
 0x2ac   : > { %v739_v50 = vsub.f32 %v699_v36, %v733_v49 }
 0x2ad   : > { %v736_v51 = vpop.xlane.xlu0 %735 }
 0x2ae   : > { %v745_v52 = vmul.f32 1.442695, %v739_v50  ;;  %v740_v53 = vsub.f32 %v722_v38, %v736_v51 }
 0x2b0   : > { %2027 = vpow2.f32 %v745_v52  ;;  %v747_v54 = vmul.f32 1.442695, %v740_v53 }
 0x2b2   : > { %2029 = vpow2.f32 %v747_v54  ;;  %v2312_v54 = vmov 32.0  }
 0x2b3   : > { %v727_v0 = vpop.xlane.xlu2 %726 }
 0x2b4   : > { %v737_v1 = vsub.f32 %v653_v41, %v727_v0 }
 0x2b6   : > { %v2028_v55 = vpop.eup %2027  ;;  %v741_v3 = vmul.f32 1.442695, %v737_v1  ;;  %v1892_v1 = vld [vmem:[%s2811_s5 + $0x8] sm:$0xff] }
 0x2b7   : > { %v755_v56 = vsel %vm636_vm1, %v2028_v55, 0.0 }
 0x2b8   : > { %v2030_v57 = vpop.eup %2029  ;;  %756 = vadd.xlane.f32.xlu2 %v755_v56 }
 0x2b9   : > { %v758_v58 = vsel %vm636_vm1, %v2030_v57, 0.0 }
 0x2ba   : > { %759 = vadd.xlane.f32.xlu0 %v758_v58 }
 0x2bb   : > { %v730_v59 = vpop.xlane.xlu1 %729 }
 0x2bc   : > { %v738_v60 = vsub.f32 %v676_v46, %v730_v59 }
 0x2be   : > { %v743_v61 = vmul.f32 1.442695, %v738_v60 }
 0x2c0   : > { %2031 = vpow2.f32 %v743_v61 }
 0x2c1   : > { %2033 = vpow2.f32 %v741_v3  ;;  %v1891_v3 = vld [vmem:[%s2811_s5] sm:$0xff] }
 0x2c6   : > { %v2032_v62 = vpop.eup %2031 }
 0x2c7   : > { %v752_v63 = vsel %vm636_vm1, %v2032_v62, 0.0  ;;  %v2034_v4 = vpop.eup %2033 }
 0x2c8   : > { %753 = vadd.xlane.f32.xlu1 %v752_v63  ;;  %v749_v5 = vsel %vm636_vm1, %v2034_v4, 0.0 }
 0x2ce   : > { %837 = vrot.lane.b32.xlu0 %v703_v21, %s2308_s24 }
 0x2d0   : > { %816 = vrot.lane.b32.xlu2 %v2551_v16, %s2308_s24 }
 0x2d6   : > { %773 = vrot.lane.b32.xlu0 %v2543_v10, %s2308_s24 }
 0x2e1   : > { %795 = vrot.lane.b32.xlu1 %v2547_v13, %s2308_s24 }
 0x30b   : > { %750 = vadd.xlane.f32.xlu1 %v749_v5 }
 0x32b   : > { %v757_v6 = vpop.xlane.xlu2 %756 }
 0x32c   : > { %2035 = vrcp.f32 %v757_v6 }
 0x32d   : > { %v760_v9 = vpop.xlane.xlu0 %759 }
 0x32e   : > { %2037 = vrcp.f32 %v760_v9 }
 0x332   : > { %v2036_v7 = vpop.eup %2035 }
 0x333   : > { %v767_v8 = vmul.f32 %v2036_v7, %v2028_v55  ;;  %v817_v11 = vpop.permute.xlu2 %816  ;;  %v1895_v7 = vld [vmem:[%s2813_s7 + $0x10] sm:$0xff] }
 0x334   : > { %v822_v10 = vsel %vm778_vm3, %v817_v11, 0  ;;  %v2038_v13 = vpop.eup %2037 }
 0x335   : > { %831 = vmatpush.bf16.msrb.mxu3 %v822_v10  ;;  %v771_v12 = vpack.c.bf16 %v767_v8, %v767_v8  ;;  %v768_v14 = vmul.f32 %v2038_v13, %v2030_v57 }
 0x337   : > { %v772_v17 = vpack.c.bf16 %v768_v14, %v768_v14 }
 0x338   : > { %1760 = vmatmul.msk.bf16.vlgmr.msrb.gmra.mxu3 %vm636_vm1, %v771_v12 }
 0x33b   : > { %v754_v18 = vpop.xlane.xlu1 %753 }
 0x33c   : > { %2039 = vrcp.f32 %v754_v18 }
 0x340   : > { %v838_v15 = vpop.permute.xlu0 %837 }
 0x341   : > { %v843_v16 = vsel %vm778_vm3, %v838_v15, 0  ;;  %v2012_v15 = vld [vmem:[#allocation7] ss:$0 sm:$0xff] }
 0x342   : > { %852 = vmatpush.bf16.msra.mxu0 %v843_v16  ;;  %v2040_v21 = vpop.eup %2039 }
 0x343   : > { %v766_v22 = vmul.f32 %v2040_v21, %v2032_v62 }
 0x345   : > { %1761 = vmatmul.msk.bf16.vlgmr.msra.gmra.mxu0 %vm636_vm1, %v772_v17  ;;  %v770_v25 = vpack.c.bf16 %v766_v22, %v766_v22  ;;  %v2013_v17 = vld [vmem:[%s2816_s10] ss:$0 sm:$0xff]  ;;  %v1894_v22 = vld [vmem:[%s2813_s7 + $0x8] sm:$0xff] }
 0x348   : > { %v774_v19 = vpop.permute.xlu0 %773 }
 0x349   : > { %v780_v20 = vsel %vm778_vm3, %v774_v19, 0 }
 0x34a   : > { %789 = vmatpush.bf16.msrb.mxu1 %v780_v20 }
 0x34e   : > { %905 = vmatpush.bf16.msra.mxu1 %v1890_v39 }
 0x352   : > { %906 = vmatpush.bf16.msra.mxu1 %v1889_v40 }
 0x353   : > { %v796_v23 = vpop.permute.xlu1 %795 }
 0x354   : > { %v801_v24 = vsel %vm778_vm3, %v796_v23, 0  ;;  %v1893_v23 = vld [vmem:[%s2813_s7] sm:$0xff] }
 0x355   : > { %810 = vmatpush.bf16.msrb.mxu2 %v801_v24  ;;  %v2014_v24 = vld [vmem:[%s2812_s6] ss:$0 sm:$0xff] }
 0x358   : > { %1759 = vmatmul.msk.bf16.vlgmr.msrb.gmra.mxu2 %vm636_vm1, %v770_v25 }
 0x359   : > { %982 = vmatpush.bf16.msra.mxu2 %v1892_v1 }
 0x35d   : > { %983 = vmatpush.bf16.msra.mxu2 %v1891_v3 }
 0x37e   : > { %v751_v26 = vpop.xlane.xlu1 %750 }
 0x37f   : > { %2041 = vrcp.f32 %v751_v26 }
 0x380   : > { %2043 = vrcp.f32 %v2312_v54 }
 0x385   : > { %v2042_v27 = vpop.eup %2041 }
 0x386   : > { %v765_v28 = vmul.f32 %v2042_v27, %v2034_v4  ;;  %v2044_v55 = vpop.eup %2043  ;;  %v1896_v4 = vld [vmem:[%s2813_s7 + $0x18] sm:$0xff] }
 0x387   : > { %v919_v56 = vmul.f32 32.0, %v2044_v55  ;;  %vm923_vm6 = vweird.f32 %v2044_v55  ;;  %1035 = vmatpush.bf16.msra.mxu3 %v1896_v4 }
 0x388   : > { %v769_v29 = vpack.c.bf16 %v765_v28, %v765_v28 }
 0x389   : > { %v920_v57 = vsub.f32 1.0, %v919_v56 }
 0x38a   : > { %1758 = vmatmul.msk.bf16.vlgmr.msrb.gmra.mxu1 %vm636_vm1, %v769_v29 }
 0x38b   : > { %v921_v58 = vmul.f32 %v2044_v55, %v920_v57  ;;  %1036 = vmatpush.bf16.msra.mxu3 %v1895_v7 }
 0x38d   : > { %v922_v59 = vadd.f32 %v2044_v55, %v921_v58 }
 0x38f   : > { %v2611_v60 = vsel %vm923_vm6, %v2044_v55, %v922_v59  ;;  %1037 = vmatpush.bf16.msra.mxu3 %v1894_v22  ;;  %v2017_v55 = vld [vmem:[%s2850_s23] ss:$0 sm:$0xff] }
 0x393   : > { %1038 = vmatpush.bf16.msra.mxu3 %v1893_v23 }
 0x3bb   : > { %v833_v30 = vpop.f32.mrf.mxu3 }
 0x3bc   : > { %863 = vrot.lane.b32.xlu0 %v833_v30, %s2828_s14  ;;  %v2015_v30 = vld [vmem:[%s2814_s8] ss:$0 sm:$0xff]  ;;  %s1618_s14 = sshll.u32 %s577_s16, 4  ;;  %s1619_s14 = int_to_ptr.vmem [resolvable:$true] %s1618_s14 }
 0x3c2   : > { %v854_v31 = vpop.f32.mrf.mxu0 }
 0x3c3   : > { %v835_v32 = vpop.f32.mrf.mxu3 }
 0x3ca   : > { %v856_v33 = vpop.f32.mrf.mxu0 }
 0x3db   : > { %v812_v35 = vpop.f32.mrf.mxu2 }
 0x3dc   : > { %859 = vrot.lane.b32.xlu2 %v812_v35, %s2310_s28 }
 0x3e3   : > { %v814_v36 = vpop.f32.mrf.mxu2 }
 0x3e4   : > { %867 = vrot.lane.b32.xlu2 %v854_v31, %s2311_s15 }
 0x407   : > { %v791_v37 = vpop.f32.mrf.mxu1 }
 0x40f   : > { %v793_v38 = vpop.f32.mrf.mxu1 }
 0x42e   : > { %v864_v43 = vpop.permute.xlu0 %863 }
 0x436   : > { %v860_v41 = vpop.permute.xlu2 %859 }
 0x437   : > { %v870_v42 = vsel %vm636_vm1, %v791_v37, %v860_v41 }
 0x438   : > { %v872_v45 = vsel %vm871_vm4, %v870_v42, %v864_v43  ;;  %v1898_v42 = vld [vmem:[%s2807_s1 + $0x18] sm:$0xff]  ;;  %v1897_v43 = vld [vmem:[%s2807_s1 + $0x10] sm:$0xff] }
 0x439   : > { %1109 = vmatpush.bf16.msrb.mxu0 %v1898_v42 }
 0x43d   : > { %1110 = vmatpush.bf16.msrb.mxu0 %v1897_v43 }
 0x43e   : > { %v868_v44 = vpop.permute.xlu2 %867 }
 0x43f   : > { %v874_v46 = vsel %vm873_vm5, %v872_v45, %v868_v44 }
 0x440   : > { %v875_v47 = vpack.c.bf16 %v874_v46, %v874_v46 }
 0x442   : > { %1770 = vmatmul.msk.bf16.vlgmr.msra.gmra.mxu1 %vm607_vm0, %v875_v47 }
 0x4bf   : > { %v908_v49 = vpop.f32.mrf.mxu1 }
 0x4c0   : > { %v909_v50 = vadd.f32 %v2011_v48, %v908_v49 }
 0x4c2   : > { %v912_v51 = vadd.f32 %v909_v50, %v2535_v2 }
 0x4c4   : > { %v915_v52 = vsel %vm607_vm0, %v912_v51, 0.0 }
 0x4c5   : > { %916 = vadd.xlane.f32.xlu0 %v915_v52 }
 0x4c7   : > { %v910_v53 = vpop.f32.mrf.mxu1 }
 0x4c8   : > { %v2016_v53 = vld [vmem:[#allocation8] ss:$0 sm:$0xff] }
 0x538   : > { %v917_v61 = vpop.xlane.xlu0 %916 }
 0x539   : > { %v925_v62 = vmul.f32 %v2611_v60, %v917_v61  ;;  %v2018_v61 = vld [vmem:[#allocation5 + $0x1] ss:$0 sm:$0xff] }
 0x53b   : > { %v926_v63 = vsub.f32 %v912_v51, %v925_v62 }
 0x53d   : > { %v927_v0 = vmul.f32 %v926_v63, %v926_v63 }
 0x53f   : > { %v928_v2 = vsel %vm607_vm0, %v927_v0, 0.0 }
 0x540   : > { %929 = vadd.xlane.f32.xlu2 %v928_v2 }
 0x5b3   : > { %v930_v5 = vpop.xlane.xlu2 %929 }
 0x5b4   : > { %v931_v6 = vmul.f32 %v930_v5, %v2611_v60 }
 0x5b6   : > { %v932_v8 = vadd.f32 1e-05, %v931_v6 }
 0x5b8   : > { %2045 = vrsqrt.f32 %v932_v8  ;;  %vm939_vm8 = vweird.f32 %v932_v8 }
 0x5be   : > { %v2046_v9 = vpop.eup %2045 }
 0x5bf   : > { %v934_v11 = vmul.f32 %v2046_v9, %v932_v8  ;;  %vm940_vm7 = vweird.f32 %v2046_v9 }
 0x5c0   : > { %vm941_vm9 = vmor %vm939_vm8, %vm940_vm7 }
 0x5c1   : > { %v935_v10 = vmul.f32 %v2046_v9, %v934_v11 }
 0x5c3   : > { %v936_v12 = vmul.f32 0.5, %v935_v10 }
 0x5c5   : > { %v937_v13 = vsub.f32 1.5, %v936_v12 }
 0x5c7   : > { %v938_v14 = vmul.f32 %v2046_v9, %v937_v13 }
 0x5c9   : > { %v942_v16 = vsel %vm941_vm9, %v2046_v9, %v938_v14 }
 0x5ca   : > { %v943_v18 = vmul.f32 %v942_v16, %v926_v63 }
 0x5cc   : > { %v947_v19 = vmul.f32 %v2012_v15, %v943_v18 }
 0x5ce   : > { %v951_v20 = vadd.f32 %v2013_v17, %v947_v19 }
 0x5d0   : > { %v952_v21 = vpack.c.bf16 %v951_v20, %v951_v20 }
 0x5d2   : > { %1779 = vmatmul.msk.bf16.vlgmr.msra.gmra.mxu2 %vm607_vm0, %v952_v21 }
 0x655   : > { %v985_v25 = vpop.f32.mrf.mxu2 }
 0x656   : > { %v986_v26 = vadd.f32 %v2014_v24, %v985_v25 }
 0x658   : > { %v989_v27 = vmax.f32 %v986_v26, 0.0 }
 0x65a   : > { %v990_v28 = vpack.c.bf16 %v989_v27, %v989_v27 }
 0x65c   : > { %1796 = vmatmul.msk.bf16.vlgmr.msra.gmra.mxu3 %vm1027_vm10, %v990_v28 }
 0x65d   : > { %v987_v29 = vpop.f32.mrf.mxu2 }
 0x6df   : > { %v1040_v31 = vpop.f32.mrf.mxu3 }
 0x6e0   : > { %v1041_v32 = vadd.f32 %v2015_v30, %v1040_v31 }
 0x6e2   : > { %v1044_v33 = vadd.f32 %v1041_v32, %v951_v20 }
 0x6e4   : > { %v1047_v35 = vsel %vm607_vm0, %v1044_v33, 0.0 }
 0x6e5   : > { %1048 = vadd.xlane.f32.xlu1 %v1047_v35 }
 0x6e7   : > { %v1042_v36 = vpop.f32.mrf.mxu3 }
 0x758   : > { %v1049_v37 = vpop.xlane.xlu1 %1048 }
 0x759   : > { %v1050_v38 = vmul.f32 %v1049_v37, %v2611_v60 }
 0x75b   : > { %v1051_v39 = vsub.f32 %v1044_v33, %v1050_v38 }
 0x75d   : > { %v1052_v40 = vmul.f32 %v1051_v39, %v1051_v39 }
 0x75f   : > { %v1053_v41 = vsel %vm607_vm0, %v1052_v40, 0.0 }
 0x760   : > { %1054 = vadd.xlane.f32.xlu1 %v1053_v41 }
 0x7d3   : > { %v1055_v44 = vpop.xlane.xlu1 %1054 }
 0x7d4   : > { %v1056_v45 = vmul.f32 %v1055_v44, %v2611_v60 }
 0x7d6   : > { %v1057_v46 = vadd.f32 1e-05, %v1056_v45 }
 0x7d8   : > { %2047 = vrsqrt.f32 %v1057_v46  ;;  %vm1064_vm12 = vweird.f32 %v1057_v46 }
 0x7de   : > { %v2048_v47 = vpop.eup %2047 }
 0x7df   : > { %v1059_v48 = vmul.f32 %v2048_v47, %v1057_v46  ;;  %vm1065_vm11 = vweird.f32 %v2048_v47 }
 0x7e0   : > { %vm1066_vm13 = vmor %vm1064_vm12, %vm1065_vm11 }
 0x7e1   : > { %v1060_v49 = vmul.f32 %v2048_v47, %v1059_v48 }
 0x7e3   : > { %v1061_v50 = vmul.f32 0.5, %v1060_v49 }
 0x7e5   : > { %v1062_v51 = vsub.f32 1.5, %v1061_v50 }
 0x7e7   : > { %v1063_v52 = vmul.f32 %v2048_v47, %v1062_v51 }
 0x7e9   : > { %v1067_v54 = vsel %vm1066_vm13, %v2048_v47, %v1063_v52 }
 0x7ea   : > { %v1068_v56 = vmul.f32 %v1067_v54, %v1051_v39 }
 0x7ec   : > { %v1072_v57 = vmul.f32 %v2016_v53, %v1068_v56 }
 0x7ee   : > { %v2658_v58 = vadd.f32 %v2017_v55, %v1072_v57 }
 0x7f0   : > { %v1077_v59 = vpack.c.bf16 %v2658_v58, %v2658_v58 }
 0x7f2   : > { %1809 = vmatmul.msk.bf16.vlgmr.msrb.gmra.mxu0 %vm607_vm0, %v1077_v59 }
 0x86f   : > { %v1112_v62 = vpop.f32.mrf.mxu0 }
 0x870   : > { %v1113_v63 = vadd.f32 %v2018_v61, %v1112_v62 }
 0x872   : > { %v1116_v0 = vpack.c.bf16 %v1113_v63, %v1113_v63 }
 0x874   : > { %1122 = vrot.lane.b32.xlu2 %v1116_v0, %s2303_s12  ;;  %1120 = vrot.lane.b32.xlu0 %v1116_v0, %s2305_s29  ;;  %v1124_v10 = vunpack.c.l.b16 %v1116_v0  ;;  %s2851_s12 = smov 16   ;;  %s2852_s29 = sld [smem:[#allocation25_spill]] }
 0x875   : > { %1118 = vrot.lane.b32.xlu1 %v1116_v0, %s2304_s17 }
 0x876   : > { %v1125_v12 = vpack.c.b16 %v1124_v10, %v1124_v10 }
 0x877   : > { %v1114_v2 = vpop.f32.mrf.mxu0 }
 0x87a   : > { %s2239_s17 = scalar_lea.hbm %s2852_s29, 16 }
 0x8ce   : > { %v1123_v1 = vpop.permute.xlu2 %1122 }
 0x8cf   : > { %v1193_v3 = vunpack.c.l.b16 %v1123_v1 }
 0x8d1   : > { %v1194_v4 = vpack.c.b16 %v1193_v3, %v1193_v3 }
 0x8d3   : > { %1195 = vrot.lane.b32.xlu2 %v1194_v4, %s2306_s2 }
 0x8e6   : > { %v1121_v5 = vpop.permute.xlu0 %1120 }
 0x8e7   : > { %v1170_v6 = vunpack.c.l.b16 %v1121_v5  ;;  %v1119_v7 = vpop.permute.xlu1 %1118 }
 0x8e8   : > { %v1147_v8 = vunpack.c.l.b16 %v1119_v7 }
 0x8e9   : > { %v2667_v9 = vpack.c.b16 %v1170_v6, %v1170_v6 }
 0x8ea   : > { %v2669_v11 = vpack.c.b16 %v1147_v8, %v1147_v8 }
 0x8eb   : > { %1172 = vrot.lane.b32.xlu1 %v2667_v9, %s2306_s2 }
 0x8ec   : > { %1149 = vrot.lane.b32.xlu0 %v2669_v11, %s2306_s2 }
 0x8f4   : > { %1126 = vrot.lane.b32.xlu0 %v1125_v12, %s2306_s2  ;;  %s1616_s2 = scalar_lea.hbm %s2852_s29, %s1884_s30 }
 0x8f5   : > { %s1620_s11 = sshll.u32 %s1616_s2, 4  ;;  %s1621_s11 = int_to_ptr.hbm [resolvable:$true] %s1620_s11 }
 0x8f6   : > { %s2233_s25 = sshra.s32 %s1621_s11, 4  ;;  %s2234_s25 = int_to_ptr.hbm [resolvable:$true] %s2233_s25 }
 0x8f7   : > { %s2235_s26 = scalar_lea.hbm %s2234_s25, 8  ;;  %p2240_p12 = scmp.lt.s32.totalorder %s2234_s25, %s2852_s29 }
 0x8f8   : > { %p2236_p1 = scmp.ne.s32.totalorder %s2234_s25, %s2235_s26  ;;  %p2241_p7 = scmp.lt.s32.totalorder %s2239_s17, %s2235_s26 }
 0x8fa   : > { %p2237_p3 = pnand %p2236_p1, %p2480_p4  ;;  %p2242_p8 = por %p2241_p7, %p2240_p12 }
 0x8fc   : > { %p2238_p5 = pneg %p2237_p3 }
 0x8fe   : > { %p2243_p9 = pnand %p2242_p8, %p2238_p5 }
 0x92d   : > { %v1196_v13 = vpop.permute.xlu2 %1195 }
 0x92e   : > { %v1201_v14 = vsel %vm636_vm1, %v1196_v13, 0 }
 0x92f   : > { %1210 = vmatpush.bf16.xpose.msra.mxu0 %v1201_v14 }
 0x936   : > { %1813 = vmatmul.msk.bf16.vlgmr.msra.gmra.mxu0 %vm636_vm1, %v1123_v1 }
 0x95d   : > { %v1173_v15 = vpop.permute.xlu1 %1172 }
 0x95e   : > { %v1150_v16 = vpop.permute.xlu0 %1149  ;;  %v1178_v17 = vsel %vm636_vm1, %v1173_v15, 0 }
 0x95f   : > { %v1155_v18 = vsel %vm636_vm1, %v1150_v16, 0  ;;  %1187 = vmatpush.bf16.xpose.msrb.mxu3 %v1178_v17 }
 0x960   : > { %1164 = vmatpush.bf16.xpose.msrb.mxu2 %v1155_v18 }
 0x966   : > { %v1127_v19 = vpop.permute.xlu0 %1126  ;;  %1812 = vmatmul.msk.bf16.vlgmr.msrb.gmra.mxu3 %vm636_vm1, %v1121_v5 }
 0x967   : > { %v1132_v20 = vsel %vm636_vm1, %v1127_v19, 0  ;;  %1811 = vmatmul.msk.bf16.vlgmr.msrb.gmra.mxu2 %vm636_vm1, %v1119_v7 }
 0x968   : > { %1141 = vmatpush.bf16.xpose.msrb.mxu1 %v1132_v20 }
 0x96f   : > { %1810 = vmatmul.msk.bf16.vlgmr.msrb.gmra.mxu1 %vm636_vm1, %v1116_v0 }
 0x9b3   : > { %v1212_v21 = vpop.f32.mrf.mxu0 }
 0x9b4   : > { %v1213_v22 = vadd.f32 %v1212_v21, %v2564_v34 }
 0x9b6   : > { %v1225_v23 = vsel %vm636_vm1, %v1213_v22, -inf }
 0x9b7   : > { %1226 = vmax.xlane.f32.xlu0 %v1225_v23 }
 0x9bb   : > { %v1214_v24 = vpop.f32.mrf.mxu0 }
 0x9e9   : > { %v1189_v25 = vpop.f32.mrf.mxu3 }
 0x9ea   : > { %v1166_v26 = vpop.f32.mrf.mxu2  ;;  %v1190_v27 = vadd.f32 %v1189_v25, %v2564_v34 }
 0x9eb   : > { %v1167_v28 = vadd.f32 %v1166_v26, %v2564_v34 }
 0x9ec   : > { %v1143_v29 = vpop.f32.mrf.mxu1  ;;  %v1222_v30 = vsel %vm636_vm1, %v1190_v27, -inf }
 0x9ed   : > { %v1219_v31 = vsel %vm636_vm1, %v1167_v28, -inf  ;;  %1223 = vmax.xlane.f32.xlu2 %v1222_v30  ;;  %v1144_v32 = vadd.f32 %v1143_v29, %v2564_v34 }
 0x9ee   : > { %1220 = vmax.xlane.f32.xlu1 %v1219_v31 }
 0x9ef   : > { %v1216_v37 = vsel %vm636_vm1, %v1144_v32, -inf }
 0x9f1   : > { %v1191_v33 = vpop.f32.mrf.mxu3 }
 0x9f2   : > { %v1168_v35 = vpop.f32.mrf.mxu2 }
 0x9f4   : > { %v1145_v36 = vpop.f32.mrf.mxu1 }
 0x9f6   : > { %1217 = vmax.xlane.f32.xlu1 %v1216_v37  ;;  %v2019_v37 = vld [vmem:[%s2810_s4 + $0x1] ss:$0 sm:$0xff] }
 0xa2a   : > { %v1227_v38 = vpop.xlane.xlu0 %1226 }
 0xa2b   : > { %v1231_v39 = vsub.f32 %v1213_v22, %v1227_v38 }
 0xa2d   : > { %v1238_v40 = vmul.f32 1.442695, %v1231_v39 }
 0xa2f   : > { %2049 = vpow2.f32 %v1238_v40 }
 0xa35   : > { %v2050_v41 = vpop.eup %2049 }
 0xa36   : > { %v1249_v42 = vsel %vm636_vm1, %v2050_v41, 0.0 }
 0xa37   : > { %1250 = vadd.xlane.f32.xlu1 %v1249_v42 }
 0xa50   : > { %1327 = vrot.lane.b32.xlu1 %v1194_v4, %s2308_s24 }
 0xa60   : > { %v1224_v43 = vpop.xlane.xlu2 %1223 }
 0xa61   : > { %v1230_v44 = vsub.f32 %v1190_v27, %v1224_v43  ;;  %v1221_v45 = vpop.xlane.xlu1 %1220  ;;  %v1900_v27 = vld [vmem:[%s2809_s3 + $0x18] sm:$0xff] }
 0xa62   : > { %v1229_v34 = vsub.f32 %v1167_v28, %v1221_v45  ;;  %v1899_v28 = vld [vmem:[%s2809_s3 + $0x10] sm:$0xff] }
 0xa63   : > { %v1236_v46 = vmul.f32 1.442695, %v1230_v44 }
 0xa64   : > { %v1234_v47 = vmul.f32 1.442695, %v1229_v34 }
 0xa65   : > { %2051 = vpow2.f32 %v1236_v46 }
 0xa66   : > { %2053 = vpow2.f32 %v1234_v47  ;;  %v1902_v47 = vld [vmem:[%s2811_s5 + $0x18] sm:$0xff] }
 0xa69   : > { %v1218_v52 = vpop.xlane.xlu1 %1217 }
 0xa6a   : > { %v1228_v53 = vsub.f32 %v1144_v32, %v1218_v52 }
 0xa6b   : > { %v2052_v48 = vpop.eup %2051 }
 0xa6c   : > { %v2054_v49 = vpop.eup %2053  ;;  %v1246_v50 = vsel %vm636_vm1, %v2052_v48, 0.0  ;;  %v1232_v54 = vmul.f32 1.442695, %v1228_v53 }
 0xa6d   : > { %v1243_v51 = vsel %vm636_vm1, %v2054_v49, 0.0  ;;  %1247 = vadd.xlane.f32.xlu0 %v1246_v50 }
 0xa6e   : > { %1244 = vadd.xlane.f32.xlu2 %v1243_v51  ;;  %2055 = vpow2.f32 %v1232_v54  ;;  %v1905_v51 = vld [vmem:[%s2813_s7 + $0x30] sm:$0xff] }
 0xa74   : > { %v2056_v55 = vpop.eup %2055 }
 0xa75   : > { %v1240_v56 = vsel %vm636_vm1, %v2056_v55, 0.0 }
 0xa81   : > { %1306 = vrot.lane.b32.xlu0 %v2667_v9, %s2308_s24 }
 0xa86   : > { %1285 = vrot.lane.b32.xlu2 %v2669_v11, %s2308_s24 }
 0xa8e   : > { %1264 = vrot.lane.b32.xlu2 %v1125_v12, %s2308_s24 }
 0xaaa   : > { %v1251_v57 = vpop.xlane.xlu1 %1250 }
 0xaab   : > { %1241 = vadd.xlane.f32.xlu0 %v1240_v56  ;;  %2057 = vrcp.f32 %v1251_v57 }
 0xab1   : > { %v2058_v59 = vpop.eup %2057 }
 0xab2   : > { %v1259_v61 = vmul.f32 %v2058_v59, %v2050_v41 }
 0xab4   : > { %v1263_v0 = vpack.c.bf16 %v1259_v61, %v1259_v61  ;;  %v2020_v61 = vld [vmem:[#allocation7 + $0x1] ss:$0 sm:$0xff] }
 0xac2   : > { %v1328_v62 = vpop.permute.xlu1 %1327 }
 0xac3   : > { %v1333_v63 = vsel %vm778_vm3, %v1328_v62, 0 }
 0xac4   : > { %1342 = vmatpush.bf16.msrb.mxu0 %v1333_v63  ;;  %v2021_v63 = vld [vmem:[%s2816_s10 + $0x1] ss:$0 sm:$0xff] }
 0xac7   : > { %1817 = vmatmul.msk.bf16.vlgmr.msrb.gmra.mxu0 %vm636_vm1, %v1263_v0 }
 0xae0   : > { %v1248_v1 = vpop.xlane.xlu0 %1247 }
 0xae1   : > { %v1245_v2 = vpop.xlane.xlu2 %1244 }
 0xae2   : > { %2059 = vrcp.f32 %v1245_v2 }
 0xae3   : > { %2061 = vrcp.f32 %v1248_v1 }
 0xae8   : > { %v2060_v3 = vpop.eup %2059 }
 0xae9   : > { %v1257_v4 = vmul.f32 %v2060_v3, %v2054_v49  ;;  %v1286_v5 = vpop.permute.xlu2 %1285  ;;  %v2062_v8 = vpop.eup %2061 }
 0xaea   : > { %v1291_v6 = vsel %vm778_vm3, %v1286_v5, 0  ;;  %v1258_v11 = vmul.f32 %v2062_v8, %v2052_v48  ;;  %v1906_v48 = vld [vmem:[%s2813_s7 + $0x38] sm:$0xff]  ;;  %v1903_v5 = vld [vmem:[%s2813_s7 + $0x20] sm:$0xff] }
 0xaeb   : > { %v1261_v7 = vpack.c.bf16 %v1257_v4, %v1257_v4  ;;  %1300 = vmatpush.bf16.msra.mxu2 %v1291_v6  ;;  %v1904_v4 = vld [vmem:[%s2813_s7 + $0x28] sm:$0xff]  ;;  %v2022_v6 = vld [vmem:[%s2812_s6 + $0x1] ss:$0 sm:$0xff] }
 0xaec   : > { %v1262_v14 = vpack.c.bf16 %v1258_v11, %v1258_v11 }
 0xaee   : > { %1815 = vmatmul.msk.bf16.vlgmr.msra.gmra.mxu2 %vm636_vm1, %v1261_v7 }
 0xaef   : > { %1469 = vmatpush.bf16.msrb.mxu2 %v1902_v47 }
 0xaf1   : > { %v1265_v9 = vpop.permute.xlu2 %1264 }
 0xaf2   : > { %v1270_v10 = vsel %vm778_vm3, %v1265_v9, 0 }
 0xaf3   : > { %1279 = vmatpush.bf16.msra.mxu1 %v1270_v10  ;;  %v1307_v12 = vpop.permute.xlu0 %1306 }
 0xaf4   : > { %v1312_v13 = vsel %vm778_vm3, %v1307_v12, 0  ;;  %v2023_v12 = vld [vmem:[%s2814_s8 + $0x1] ss:$0 sm:$0xff] }
 0xaf5   : > { %1321 = vmatpush.bf16.msra.mxu3 %v1312_v13 }
 0xaf7   : > { %1395 = vmatpush.bf16.msrb.mxu1 %v1900_v27 }
 0xaf8   : > { %1816 = vmatmul.msk.bf16.vlgmr.msra.gmra.mxu3 %vm636_vm1, %v1262_v14 }
 0xaf9   : > { %1523 = vmatpush.bf16.msrb.mxu3 %v1906_v48 }
 0xafb   : > { %1396 = vmatpush.bf16.msrb.mxu1 %v1899_v28 }
 0xafd   : > { %1524 = vmatpush.bf16.msrb.mxu3 %v1905_v51 }
 0xb01   : > { %1525 = vmatpush.bf16.msrb.mxu3 %v1904_v4 }
 0xb05   : > { %1526 = vmatpush.bf16.msrb.mxu3 %v1903_v5 }
 0xb1e   : > { %v1242_v15 = vpop.xlane.xlu0 %1241 }
 0xb1f   : > { %2063 = vrcp.f32 %v1242_v15 }
 0xb25   : > { %v2064_v16 = vpop.eup %2063 }
 0xb26   : > { %v1256_v17 = vmul.f32 %v2064_v16, %v2056_v55 }
 0xb28   : > { %v1260_v18 = vpack.c.bf16 %v1256_v17, %v1256_v17 }
 0xb2a   : > { %1814 = vmatmul.msk.bf16.vlgmr.msra.gmra.mxu1 %vm636_vm1, %v1260_v18 }
 0xb44   : > { %v1344_v19 = vpop.f32.mrf.mxu0 }
 0xb4c   : > { %v1346_v20 = vpop.f32.mrf.mxu0 }
 0xb71   : > { %v1302_v21 = vpop.f32.mrf.mxu2 }
 0xb72   : > { %1349 = vrot.lane.b32.xlu1 %v1302_v21, %s2310_s28 }
 0xb79   : > { %v1304_v22 = vpop.f32.mrf.mxu2 }
 0xb7a   : > { %1357 = vrot.lane.b32.xlu1 %v1344_v19, %s2311_s15  ;;  %s2853_s15 = sld [smem:[#allocation24_spill]] }
 0xb7b   : > { %v1323_v23 = vpop.f32.mrf.mxu3 }
 0xb7c   : > { %1353 = vrot.lane.b32.xlu2 %v1323_v23, %s2851_s12  ;;  %v1908_v23 = vld [vmem:[#allocation10 + $0x8] sm:$0xff] }
 0xb7d   : > { %1597 = vmatpush.bf16.msra.mxu0 %v1908_v23 }
 0xb83   : > { %v1325_v24 = vpop.f32.mrf.mxu3 }
 0xb84   : > { %v1907_v24 = vld [vmem:[#allocation10] sm:$0xff] }
 0xb85   : > { %1598 = vmatpush.bf16.msra.mxu0 %v1907_v24 }
 0xba7   : > { %v1281_v25 = vpop.f32.mrf.mxu1 }
 0xbaf   : > { %v1283_v26 = vpop.f32.mrf.mxu1 }
 0xbd6   : > { %v1354_v31 = vpop.permute.xlu2 %1353 }
 0xbe4   : > { %v1350_v29 = vpop.permute.xlu1 %1349 }
 0xbe5   : > { %v1360_v30 = vsel %vm636_vm1, %v1281_v25, %v1350_v29 }
 0xbe6   : > { %v1361_v33 = vsel %vm871_vm4, %v1360_v30, %v1354_v31 }
 0xbec   : > { %v1358_v32 = vpop.permute.xlu1 %1357 }
 0xbed   : > { %v1362_v35 = vsel %vm873_vm5, %v1361_v33, %v1358_v32 }
 0xbee   : > { %v1363_v36 = vpack.c.bf16 %v1362_v35, %v1362_v35  ;;  %v2024_v35 = vld [vmem:[#allocation8 + $0x1] ss:$0 sm:$0xff] }
 0xbf0   : > { %1831 = vmatmul.msk.bf16.vlgmr.msrb.gmra.mxu1 %vm607_vm0, %v1363_v36 }
 0xc6d   : > { %v1398_v38 = vpop.f32.mrf.mxu1 }
 0xc6e   : > { %v1399_v39 = vadd.f32 %v2019_v37, %v1398_v38 }
 0xc70   : > { %v1402_v40 = vadd.f32 %v1399_v39, %v2658_v58  ;;  %v1901_v58 = vld [vmem:[%s2811_s5 + $0x10] sm:$0xff] }
 0xc71   : > { %1470 = vmatpush.bf16.msrb.mxu2 %v1901_v58 }
 0xc72   : > { %v1407_v41 = vsel %vm607_vm0, %v1402_v40, 0.0 }
 0xc73   : > { %1408 = vadd.xlane.f32.xlu2 %v1407_v41  ;;  %v2026_v41 = vld [vmem:[%s2853_s15] ss:$0 sm:$0xff] }
 0xc75   : > { %v1400_v42 = vpop.f32.mrf.mxu1 }
 0xce6   : > { %v1409_v43 = vpop.xlane.xlu2 %1408 }
 0xce7   : > { %v1410_v44 = vmul.f32 %v1409_v43, %v2611_v60 }
 0xce9   : > { %v1411_v45 = vsub.f32 %v1402_v40, %v1410_v44 }
 0xceb   : > { %v1412_v34 = vmul.f32 %v1411_v45, %v1411_v45 }
 0xced   : > { %v1413_v46 = vsel %vm607_vm0, %v1412_v34, 0.0 }
 0xcee   : > { %1414 = vadd.xlane.f32.xlu1 %v1413_v46 }
 0xd61   : > { %v1415_v49 = vpop.xlane.xlu1 %1414 }
 0xd62   : > { %v1416_v50 = vmul.f32 %v1415_v49, %v2611_v60 }
 0xd64   : > { %v1417_v52 = vadd.f32 1e-05, %v1416_v50 }
 0xd66   : > { %2065 = vrsqrt.f32 %v1417_v52  ;;  %vm1424_vm15 = vweird.f32 %v1417_v52 }
 0xd6c   : > { %v2066_v53 = vpop.eup %2065 }
 0xd6d   : > { %v1419_v54 = vmul.f32 %v2066_v53, %v1417_v52  ;;  %vm1425_vm14 = vweird.f32 %v2066_v53 }
 0xd6e   : > { %vm1426_vm1 = vmor %vm1424_vm15, %vm1425_vm14 }
 0xd6f   : > { %v1420_v55 = vmul.f32 %v2066_v53, %v1419_v54 }
 0xd71   : > { %v1421_v56 = vmul.f32 0.5, %v1420_v55 }
 0xd73   : > { %v1422_v57 = vsub.f32 1.5, %v1421_v56 }
 0xd75   : > { %v1423_v59 = vmul.f32 %v2066_v53, %v1422_v57 }
 0xd77   : > { %v1427_v62 = vsel %vm1426_vm1, %v2066_v53, %v1423_v59 }
 0xd78   : > { %v1428_v0 = vmul.f32 %v1427_v62, %v1411_v45 }
 0xd7a   : > { %v1432_v2 = vmul.f32 %v2020_v61, %v1428_v0 }
 0xd7c   : > { %v1436_v1 = vadd.f32 %v2021_v63, %v1432_v2 }
 0xd7e   : > { %v1437_v3 = vpack.c.bf16 %v1436_v1, %v1436_v1 }
 0xd80   : > { %1846 = vmatmul.msk.bf16.vlgmr.msrb.gmra.mxu2 %vm607_vm0, %v1437_v3 }
 0xe03   : > { %v1472_v7 = vpop.f32.mrf.mxu2 }
 0xe04   : > { %v1473_v8 = vadd.f32 %v2022_v6, %v1472_v7 }
 0xe06   : > { %v1476_v9 = vmax.f32 %v1473_v8, 0.0 }
 0xe08   : > { %v1477_v11 = vpack.c.bf16 %v1476_v9, %v1476_v9 }
 0xe0a   : > { %1872 = vmatmul.msk.bf16.vlgmr.msrb.gmra.mxu3 %vm1027_vm10, %v1477_v11 }
 0xe0b   : > { %v1474_v10 = vpop.f32.mrf.mxu2 }
 0xe8d   : > { %v1528_v13 = vpop.f32.mrf.mxu3 }
 0xe8e   : > { %v1529_v14 = vadd.f32 %v2023_v12, %v1528_v13 }
 0xe90   : > { %v1532_v15 = vadd.f32 %v1529_v14, %v1436_v1 }
 0xe92   : > { %v1537_v16 = vsel %vm607_vm0, %v1532_v15, 0.0 }
 0xe93   : > { %1538 = vadd.xlane.f32.xlu0 %v1537_v16 }
 0xe95   : > { %v1530_v17 = vpop.f32.mrf.mxu3 }
 0xf06   : > { %v1539_v18 = vpop.xlane.xlu0 %1538 }
 0xf07   : > { %v1540_v19 = vmul.f32 %v1539_v18, %v2611_v60 }
 0xf09   : > { %v1541_v20 = vsub.f32 %v1532_v15, %v1540_v19 }
 0xf0b   : > { %v1542_v21 = vmul.f32 %v1541_v20, %v1541_v20 }
 0xf0d   : > { %v1543_v22 = vsel %vm607_vm0, %v1542_v21, 0.0 }
 0xf0e   : > { %1544 = vadd.xlane.f32.xlu0 %v1543_v22 }
 0xf81   : > { %v1545_v25 = vpop.xlane.xlu0 %1544 }
 0xf82   : > { %v1546_v26 = vmul.f32 %v1545_v25, %v2611_v60  ;;  %v2025_v60 = vld [vmem:[%s2850_s23 + $0x1] ss:$0 sm:$0xff] }
 0xf84   : > { %v1547_v27 = vadd.f32 1e-05, %v1546_v26 }
 0xf86   : > { %2067 = vrsqrt.f32 %v1547_v27  ;;  %vm1554_vm3 = vweird.f32 %v1547_v27 }
 0xf8c   : > { %v2068_v28 = vpop.eup %2067 }
 0xf8d   : > { %v1549_v29 = vmul.f32 %v2068_v28, %v1547_v27  ;;  %vm1555_vm2 = vweird.f32 %v2068_v28 }
 0xf8e   : > { %vm1556_vm4 = vmor %vm1554_vm3, %vm1555_vm2 }
 0xf8f   : > { %v1550_v30 = vmul.f32 %v2068_v28, %v1549_v29 }
 0xf91   : > { %v1551_v31 = vmul.f32 0.5, %v1550_v30 }
 0xf93   : > { %v1552_v32 = vsub.f32 1.5, %v1551_v31 }
 0xf95   : > { %v1553_v33 = vmul.f32 %v2068_v28, %v1552_v32 }
 0xf97   : > { %v1557_v36 = vsel %vm1556_vm4, %v2068_v28, %v1553_v33 }
 0xf98   : > { %v1558_v37 = vmul.f32 %v1557_v36, %v1541_v20 }
 0xf9a   : > { %v1562_v38 = vmul.f32 %v2024_v35, %v1558_v37 }
 0xf9c   : > { %v1566_v39 = vadd.f32 %v2025_v60, %v1562_v38 }
 0xf9e   : > { %v1567_v40 = vpack.c.bf16 %v1566_v39, %v1566_v39 }
 0xfa0   : > { %1882 = vmatmul.msk.bf16.vlgmr.msra.gmra.mxu0 %vm607_vm0, %v1567_v40 }
0x101d   : > { %v1600_v42 = vpop.f32.mrf.mxu0 }
0x101e   : > { %v1601_v43 = vadd.f32 %v2026_v41, %v1600_v42 }
0x1020   : > { %1604 = vst [vmem:[%s577_s16] sm:$0xff] %v1601_v43 }
0x1021   : > { %2246 = shalt.err (!%p2243_p9)
}
0x1022   : > { %1927 = dma.vmem_to_hbm [thread:$0]  (%p2480_p4), %s1619_s14, 128, %s1621_s11, %s1606_s13  }
0x1025   : > { %v1602_v44 = vpop.f32.mrf.mxu0 }
0x1026 PF: > { %s1632_s27 = sand.u32 1, %s2281_s18   ;;  %p2855_p10 = scmp.ge.s32.totalorder %s2293_s21, 2 }
0x1027   : > { %s1633_s2 = scalar_lea.sflag [#allocation4], %s1632_s27 }
0x1028   : > { %p1947_p13 = pnand %p2855_p10, %p2484_p6 }
0x102a   : > { %p1948_p11 = pneg %p1947_p13 }
0x102c   : > { %2276 = dma.done.wait (%p1948_p11), %s1633_s2, 128  }
0x102d   : > { %2278 = vsyncadd (%p1948_p11), %s1633_s2, 4294967168  ;;  %s2856_s21 = sld [smem:[#allocation17_spill]]  ;;  %s2859_s18 = smov %s2285_s19 }
0x102e   : > { %s2857_s15 = sld [smem:[#allocation16_spill]] }
0x102f   : > { %s2858_s20 = sld [smem:[#allocation18_spill]] }
0x1033   : > { %p30_p0 = scmp.ge.s32.totalorder %s2856_s21, 4  }
0x1034   : > { %s2860_s19 = smov %s2857_s15 }
0x1035   :  { %32 = sbr.rel (!%p30_p0) target bundleno = 15 (0xf), region = 153 }
0x103a   :  { %1639 = vsyncpa [#allocation3], 1 }
0x103b   :  { %1641 = vsyncpa [#allocation3 + $0x1], 1 }
0x103c   :  { %1642 = vsyncpa [#allocation6], 1 }
0x103d   :  { %1643 = vsyncpa [#allocation9], 1 }
0x103e   :  { %1644 = vsyncpa [#allocation4], 1 }
0x103f   :  { %1646 = vsyncpa [#allocation4 + $0x1], 1 }

</bundles_post_ra>
